<compile_context>
chip_gen: v5e
topology: v5e:2x2
jax: 0.10.0
libtpu: 0.0.40
codegen_flags: <defaults>
</compile_context>

<pallas_src>
import math
from functools import partial

import jax
import jax.numpy as jnp
from jax.experimental import pallas as pl
from jax.experimental.pallas import tpu as pltpu

SQRT2 = math.sqrt(2.0)
NEG_INF = -1e9


# ----------------------------------------------------------------------------
# host-side helpers (glue)
# ----------------------------------------------------------------------------
def _rope_sin_cos(seq_len, head_dim, theta):
    inv_freq = 1.0 / (theta ** (jnp.arange(0, head_dim, 2, dtype=jnp.float32) / head_dim))
    t = jnp.arange(seq_len, dtype=jnp.float32)
    freqs = jnp.einsum("i,j->ij", t, inv_freq)
    emb = jnp.concatenate([freqs, freqs], axis=-1)           # (S, head_dim)
    return jnp.sin(emb), jnp.cos(emb)


def _rope_head_perm(head_dim):
    # de-interleave: [0,2,4,...,1,3,5,...] so rotate_half becomes a half-head swap
    return jnp.concatenate([jnp.arange(0, head_dim, 2), jnp.arange(1, head_dim, 2)])


def _rotate_half(x):       # reference-only (original interleaved layout)
    x1 = x[..., 0::2]
    x2 = x[..., 1::2]
    return jnp.stack((-x2, x1), axis=-1).reshape(x.shape)


def _apply_rope(x, sin, cos):
    return x * cos + _rotate_half(x) * sin


def _const_spec(shape, index_map):
    """BlockSpec for a grid-invariant block; single-buffered when supported."""
    buffered = getattr(pl, "Buffered", None)
    if buffered is not None:
        try:
            return pl.BlockSpec(shape, index_map, pipeline_mode=buffered(1))
        except TypeError:
            pass
    return pl.BlockSpec(shape, index_map)


def _divisor_tile(n, target, multiple):
    best = None
    t = multiple
    while t <= min(n, target):
        if n % t == 0:
            best = t
        t += multiple
    return best if best is not None else n


def _pick_seq_tile(s, target=256):
    return _divisor_tile(s, target, 16)          # multiple of 16: bf16 sublane packing


def _pick_m_tile(m, target=512):
    if m % 128 != 0:
        return m
    return _divisor_tile(m, target, 128)


def _moe_vmem_bytes(tn, d, tm, e):
    """Rough VMEM footprint of the fused MoE kernel (double-buffered streams)."""
    dyn = 2 * (tn * d * 2 + tn * d * 4            # attn (bf16) + residual x (f32) tiles
               + d * tm * 2 + tm * 4              # w1 block (bf16) + b1 block
               + tm * d * 2 + d * 4               # w2 block (bf16) + b2 block
               + tn * d * 4 + 8 * e * 4)          # out block (f32) + stats block
    resident = d * d * 2 + 2 * d * 4 + d * e * 2 + e * 4   # w_out, norm ws, gate (Buffered(1))
    scratch = tn * d * 2 + tn * e * 4                      # xmoe (bf16) + combine weights
    return dyn + resident + scratch


def _pick_token_tile(n, d, tm, e, budget, prefer_tiles=2):
    cands = [t for t in range(16, n + 1, 16) if n % t == 0] or [n]
    fit = [t for t in cands if _moe_vmem_bytes(t, d, tm, e) <= budget] or [min(cands)]
    multi = [t for t in fit if n // t >= prefer_tiles]      # keep both v7x TCs busy
    return max(multi) if multi else max(fit)


# ----------------------------------------------------------------------------
# Kernel 1: RMSNorm(norm1) + q / latent-kv / up projections + fused RoPE
#           (bf16 MXU, f32 accumulation; q/k already in de-interleaved per-head
#            layout thanks to the host-side column permutation of w_q / w_uk)
# ----------------------------------------------------------------------------
def qkv_rope_kernel(x_ref, n1w_ref, sin_ref, cos_ref,
                    wq_ref, wdk_ref, wdv_ref, wuk_ref, wuv_ref,
                    q_ref, k_ref, v_ref, *, eps, num_heads, head_dim):
    x = x_ref[...]                                            # (TS, D) f32
    xn = n1w_ref[...] * x * jax.lax.rsqrt(jnp.mean(x * x, axis=-1, keepdims=True) + eps)
    xb = xn.astype(jnp.bfloat16)

    q = jnp.dot(xb, wq_ref[...], preferred_element_type=jnp.float32)
    dk = jnp.dot(xb, wdk_ref[...], preferred_element_type=jnp.float32)
    dv = jnp.dot(xb, wdv_ref[...], preferred_element_type=jnp.float32)
    k = jnp.dot(dk.astype(jnp.bfloat16), wuk_ref[...], preferred_element_type=jnp.float32)
    v = jnp.dot(dv.astype(jnp.bfloat16), wuv_ref[...], preferred_element_type=jnp.float32)

    sin = sin_ref[...]                                        # (TS, D) permuted layout
    cos = cos_ref[...]
    half = head_dim // 2

    def rope(t):
        # de-interleaved per-head layout: rotate_half == [-odd_half, even_half]
        parts = []
        for h in range(num_heads):
            a = h * head_dim
            parts.append(-t[:, a + half:a + head_dim])
            parts.append(t[:, a:a + half])
        rot = jnp.concatenate(parts, axis=-1)
        return t * cos + rot * sin

    q_ref[...] = rope(q).astype(jnp.bfloat16)
    k_ref[...] = rope(k).astype(jnp.bfloat16)
    v_ref[...] = v.astype(jnp.bfloat16)


# ----------------------------------------------------------------------------
# Kernel 2: attention, one batch element per grid step, all heads per step,
#           in-kernel causal mask, bf16 in / bf16 out, f32 softmax.
# TODO(synk): flash-style online-softmax KV tiling for long sequences (S >= 2K)
#             so the per-head (S, S) score block never materializes.
# ----------------------------------------------------------------------------
def attn_kernel(*refs, scale, num_heads, head_dim, causal):
    if causal:
        q_ref, k_ref, v_ref, o_ref = refs
    else:
        q_ref, k_ref, v_ref, mask_ref, o_ref = refs
    q = q_ref[...]                                            # (S, D) bf16
    k = k_ref[...]
    v = v_ref[...]
    s_len = q.shape[0]
    if causal:
        row = jax.lax.broadcasted_iota(jnp.int32, (s_len, s_len), 0)
        col = jax.lax.broadcasted_iota(jnp.int32, (s_len, s_len), 1)
        bias = jnp.where(row >= col, 0.0, NEG_INF).astype(jnp.float32)
    else:
        bias = mask_ref[...]

    outs = []
    for h in range(num_heads):                                # static, small H
        a = h * head_dim
        qh = q[:, a:a + head_dim]
        kh = k[:, a:a + head_dim]
        vh = v[:, a:a + head_dim]
        s = jax.lax.dot_general(qh, kh, (((1,), (1,)), ((), ())),
                                preferred_element_type=jnp.float32) * scale
        s = s + bias
        m = jnp.max(s, axis=-1, keepdims=True)
        p = jnp.exp(s - m)
        p = p / jnp.sum(p, axis=-1, keepdims=True)
        outs.append(jnp.dot(p.astype(jnp.bfloat16), vh,
                            preferred_element_type=jnp.float32))
    o_ref[...] = jnp.concatenate(outs, axis=-1).astype(jnp.bfloat16)


# ----------------------------------------------------------------------------
# Kernel 3 (fused): attn out-proj + residual + norm2 + MoE RMSNorm + gate softmax
#                   + in-kernel top-k routing + dense expert MLPs + residual.
# grid = (token_tiles, num_experts, m_tiles); experts/m are the inner reduction
# axes, the (TN, D) output tile stays resident and expert contributions
# accumulate straight into out_ref.  Per-tile gate stats go into a tiny (8, E)
# block instead of lane-sparse (N, E) outputs.
# TODO(synk): routed/grouped dispatch (scalar-prefetch group offsets over tokens
#             sorted by expert) would also skip the HBM weight stream of the
#             (E-K)/E unselected experts; the dense combine below is
#             mathematically identical to the PyTorch gather/index_add.
# ----------------------------------------------------------------------------
def moe_fused_kernel(attn_ref, x_ref, wo_ref, n2w_ref, nmw_ref, gw_ref, gb_ref,
                     w1_ref, b1_ref, w2_ref, b2_ref,
                     out_ref, stats_ref,
                     xmoe_s, cw_s, *, eps, num_experts, top_k):
    e = pl.program_id(1)
    m = pl.program_id(2)

    @pl.when((e == 0) & (m == 0))
    def _prologue():
        # attention output projection + first residual
        y = jnp.dot(attn_ref[...], wo_ref[...], preferred_element_type=jnp.float32)
        h = x_ref[...] + y
        out_ref[...] = h

        # norm2 followed by the MoE's internal RMSNorm
        xn2 = n2w_ref[...] * h * jax.lax.rsqrt(
            jnp.mean(h * h, axis=-1, keepdims=True) + eps)
        xm = nmw_ref[...] * xn2 * jax.lax.rsqrt(
            jnp.mean(xn2 * xn2, axis=-1, keepdims=True) + eps)
        xm_bf = xm.astype(jnp.bfloat16)
        xmoe_s[...] = xm_bf

        # gate linear + softmax (f32 VPU math, bf16 MXU inputs)
        logits = jnp.dot(xm_bf, gw_ref[...],
                         preferred_element_type=jnp.float32) + gb_ref[...]     # (TN, E)
        lmax = jnp.max(logits, axis=-1, keepdims=True)
        ex = jnp.exp(logits - lmax)
        probs = ex / jnp.sum(ex, axis=-1, keepdims=True)

        # in-kernel top-k -> dense, lane-contiguous (TN, E) combine weights
        ids = jax.lax.broadcasted_iota(jnp.int32, probs.shape, 1).astype(jnp.float32)
        remaining = probs
        cw = jnp.zeros_like(probs)
        for _ in range(top_k):                                # static, small K
            mx = jnp.max(remaining, axis=-1, keepdims=True)
            first = jnp.min(jnp.where(remaining == mx, ids, float(num_experts)),
                            axis=-1, keepdims=True)
            sel = ids == first
            cw = cw + jnp.where(sel, probs, 0.0)
            remaining = jnp.where(sel, -jnp.inf, remaining)
        cw_s[...] = cw

        # per-tile balance statistics (row 0: importance, row 1: load)
        imp = jnp.sum(probs, axis=0, keepdims=True)                         # (1, E)
        load = jnp.sum((cw > 0.0).astype(jnp.float32), axis=0, keepdims=True)
        ridx = jax.lax.broadcasted_iota(jnp.int32, (8, num_experts), 0)
        stats_ref[...] = jnp.where(ridx == 0, imp, jnp.where(ridx == 1, load, 0.0))

    # ---- expert e, hidden-dim tile m (bf16 weights streamed, f32 MXU accum) ----
    lane = jax.lax.broadcasted_iota(jnp.int32, cw_s.shape, 1)
    w_e = jnp.sum(jnp.where(lane == e, cw_s[...], 0.0), axis=-1, keepdims=True)  # (TN, 1)

    h1 = jnp.dot(xmoe_s[...], w1_ref[...],
                 preferred_element_type=jnp.float32) + b1_ref[...]               # (TN, TM)
    h1 = 0.5 * h1 * (1.0 + jax.lax.erf(h1 / SQRT2))           # exact GELU, f32
    contrib = jnp.dot(h1.astype(jnp.bfloat16), w2_ref[...],
                      preferred_element_type=jnp.float32)                        # (TN, D)
    b2_term = b2_ref[...] * (m == 0).astype(jnp.float32)      # expert bias added once
    out_ref[...] += w_e * (contrib + b2_term)


# ----------------------------------------------------------------------------
# Wrapper: full LatentGPTBlock forward
# ----------------------------------------------------------------------------
def latent_gpt_block_forward(x, mask, params, *, num_heads, experts_per_token,
                             eps=1e-6, rope_theta=10000.0, causal=True,
                             seq_tile=None, token_tile=None, m_tile=None):
    B, S, D = x.shape
    H = num_heads
    hd = D // H
    L = params["w_uk"].shape[0]
    E = params["gate_w"].shape[1]
    M = params["w1"].shape[2]
    K = experts_per_token
    N = B * S
    bf16 = jnp.bfloat16

    x_flat = x.reshape(N, D).astype(jnp.float32)

    # ---- RoPE folded into the weights: de-interleaved per-head column perm ----
    head_perm = _rope_head_perm(hd)
    full_perm = jnp.concatenate([head_perm + h * hd for h in range(H)])
    sin, cos = _rope_sin_cos(S, hd, rope_theta)
    sin_p = jnp.tile(sin[:, head_perm], (1, H))               # (S, D), permuted layout
    cos_p = jnp.tile(cos[:, head_perm], (1, H))

    wq = params["w_q"][:, full_perm].astype(bf16)             # bf16 weight streaming
    wuk = params["w_uk"][:, full_perm].astype(bf16)
    wdk = params["w_dk"].astype(bf16)
    wdv = params["w_dv"].astype(bf16)
    wuv = params["w_uv"].astype(bf16)

    # ---- Kernel 1: norm1 + projections + RoPE, grid over (batch, seq tiles) ----
    TS = seq_tile if seq_tile is not None else _pick_seq_tile(S)
    assert S % TS == 0
    n_seq_tiles = S // TS
    tok_map = lambda b, j: (b * n_seq_tiles + j, 0)

    q_f, k_f, v_f = pl.pallas_call(
        partial(qkv_rope_kernel, eps=eps, num_heads=H, head_dim=hd),
        out_shape=(jax.ShapeDtypeStruct((N, D), bf16),) * 3,
        grid_spec=pltpu.PrefetchScalarGridSpec(
            num_scalar_prefetch=0,
            grid=(B, n_seq_tiles),
            in_specs=[pl.BlockSpec((TS, D), tok_map),                      # x
                      _const_spec((1, D), lambda b, j: (0, 0)),            # norm1 w
                      pl.BlockSpec((TS, D), lambda b, j: (j, 0)),          # sin (perm)
                      pl.BlockSpec((TS, D), lambda b, j: (j, 0)),          # cos (perm)
                      _const_spec((D, D), lambda b, j: (0, 0)),            # w_q (perm)
                      _const_spec((D, L), lambda b, j: (0, 0)),            # w_dk
                      _const_spec((D, L), lambda b, j: (0, 0)),            # w_dv
                      _const_spec((L, D), lambda b, j: (0, 0)),            # w_uk (perm)
                      _const_spec((L, D), lambda b, j: (0, 0))],           # w_uv
            out_specs=[pl.BlockSpec((TS, D), tok_map)] * 3),
        compiler_params=pltpu.CompilerParams(
            dimension_semantics=("parallel", "parallel")),
    )(x_flat, params["norm1_w"].reshape(1, D).astype(jnp.float32), sin_p, cos_p,
      wq, wdk, wdv, wuk, wuv)

    # ---- Kernel 2: attention, one batch per step, all heads in-step ----
    attn_in = [q_f, k_f, v_f]
    attn_specs = [pl.BlockSpec((S, D), lambda b: (b, 0))] * 3
    if not causal:
        madd = mask
        if madd.dtype == jnp.bool_:
            madd = jnp.where(madd, 0.0, NEG_INF)
        madd = madd.astype(jnp.float32).reshape(S, S)
        attn_in.append(madd)
        attn_specs = attn_specs + [_const_spec((S, S), lambda b: (0, 0))]

    attn = pl.pallas_call(
        partial(attn_kernel, scale=1.0 / math.sqrt(hd), num_heads=H,
                head_dim=hd, causal=causal),
        out_shape=jax.ShapeDtypeStruct((N, D), bf16),
        grid_spec=pltpu.PrefetchScalarGridSpec(
            num_scalar_prefetch=0,
            grid=(B,),
            in_specs=attn_specs,
            out_specs=pl.BlockSpec((S, D), lambda b: (b, 0))),
        compiler_params=pltpu.CompilerParams(dimension_semantics=("parallel",)),
    )(*attn_in)

    # ---- Kernel 3: fused out-proj + residuals + norms + gate + top-k + experts ----
    TM = m_tile if m_tile is not None else _pick_m_tile(M)
    assert M % TM == 0
    n_m_tiles = M // TM

    try:
        vmem_cap = int(pltpu.get_tpu_info().vmem_capacity_bytes)
    except Exception:
        vmem_cap = 64 << 20                                   # conservative (v7x)
    vmem_budget = int(vmem_cap * 0.75)

    TN = token_tile if token_tile is not None else _pick_token_tile(N, D, TM, E, vmem_budget)
    assert N % TN == 0
    n_tok_tiles = N // TN

    w1 = params["w1"].astype(bf16)
    w2 = params["w2"].astype(bf16)
    b1 = params["b1"].reshape(E, 1, M).astype(jnp.float32)
    b2 = params["b2"].reshape(E, 1, D).astype(jnp.float32)

    cp_kwargs = dict(dimension_semantics=("parallel", "arbitrary", "arbitrary"))
    need = _moe_vmem_bytes(TN, D, TM, E) + (4 << 20)
    if need > (16 << 20):           # v5e's default scoped-VMEM limit is the smallest
        cp_kwargs["vmem_limit_bytes"] = int(min(need, vmem_budget))

    out_flat, stats = pl.pallas_call(
        partial(moe_fused_kernel, eps=eps, num_experts=E, top_k=K),
        out_shape=(jax.ShapeDtypeStruct((N, D), jnp.float32),
                   jax.ShapeDtypeStruct((n_tok_tiles, 8, E), jnp.float32)),
        grid_spec=pltpu.PrefetchScalarGridSpec(
            num_scalar_prefetch=0,
            grid=(n_tok_tiles, E, n_m_tiles),
            in_specs=[pl.BlockSpec((TN, D), lambda i, e, m: (i, 0)),           # attn (bf16)
                      pl.BlockSpec((TN, D), lambda i, e, m: (i, 0)),           # x residual
                      _const_spec((D, D), lambda i, e, m: (0, 0)),             # w_out (bf16)
                      _const_spec((1, D), lambda i, e, m: (0, 0)),             # norm2 w
                      _const_spec((1, D), lambda i, e, m: (0, 0)),             # MoE norm w
                      _const_spec((D, E), lambda i, e, m: (0, 0)),             # gate w (bf16)
                      _const_spec((1, E), lambda i, e, m: (0, 0)),             # gate b
                      pl.BlockSpec((None, D, TM), lambda i, e, m: (e, 0, m)),  # w1 (bf16)
                      pl.BlockSpec((None, 1, TM), lambda i, e, m: (e, 0, m)),  # b1
                      pl.BlockSpec((None, TM, D), lambda i, e, m: (e, m, 0)),  # w2 (bf16)
                      pl.BlockSpec((None, 1, D), lambda i, e, m: (e, 0, 0))],  # b2
            out_specs=[pl.BlockSpec((TN, D), lambda i, e, m: (i, 0)),
                       pl.BlockSpec((None, 8, E), lambda i, e, m: (i, 0, 0))],
            scratch_shapes=[pltpu.VMEM((TN, D), bf16),
                            pltpu.VMEM((TN, E), jnp.float32)]),
        compiler_params=pltpu.CompilerParams(**cp_kwargs),
    )(attn, x_flat, params["w_out"].astype(bf16),
      params["norm2_w"].reshape(1, D).astype(jnp.float32),
      params["moe_norm_w"].reshape(1, D).astype(jnp.float32),
      params["gate_w"].astype(bf16), params["gate_b"].reshape(1, E).astype(jnp.float32),
      w1, b1, w2, b2)

    # ---- glue: auxiliary balance loss from the tiny per-tile stats ----
    importance = jnp.sum(stats[:, 0, :], axis=0)
    load = jnp.sum(stats[:, 1, :], axis=0)
    balance_loss = 0.5 * (jnp.std(importance / jnp.sum(importance), ddof=1)
                          + jnp.std(load / jnp.sum(load), ddof=1))
    return out_flat.reshape(B, S, D), balance_loss


# ----------------------------------------------------------------------------
# Pure-JAX reference (same math, same bf16 MXU casts) for a correctness check
# ----------------------------------------------------------------------------
def latent_gpt_block_ref(x, mask, params, *, num_heads, experts_per_token,
                         eps=1e-6, rope_theta=10000.0):
    B, S, D = x.shape
    H = num_heads
    hd = D // H
    E = params["gate_w"].shape[1]
    K = experts_per_token
    bf = lambda t: t.astype(jnp.bfloat16)

    def mm(a, b):
        return jnp.dot(bf(a), bf(b), preferred_element_type=jnp.float32)

    xf = x.astype(jnp.float32)
    madd = mask
    if madd.dtype == jnp.bool_:
        madd = jnp.where(madd, 0.0, NEG_INF)
    madd = madd.astype(jnp.float32)

    def rms(v, w):
        return w * v * jax.lax.rsqrt(jnp.mean(v * v, axis=-1, keepdims=True) + eps)

    xn1 = rms(xf, params["norm1_w"])
    q = mm(xn1, params["w_q"])
    k = mm(mm(xn1, params["w_dk"]), params["w_uk"])
    v = mm(mm(xn1, params["w_dv"]), params["w_uv"])

    def heads(t):
        return t.reshape(B, S, H, hd).transpose(0, 2, 1, 3)

    q, k, v = heads(q), heads(k), heads(v)
    sin, cos = _rope_sin_cos(S, hd, rope_theta)
    q = _apply_rope(q, sin, cos)
    k = _apply_rope(k, sin, cos)
    # per-head feature order is mathematically irrelevant to q.k; use the kernel's
    # (de-interleaved) order so the bf16 comparison stays tight
    head_perm = _rope_head_perm(hd)
    qp, kp = q[..., head_perm], k[..., head_perm]
    s = jnp.einsum("bhqd,bhkd->bhqk", bf(qp), bf(kp),
                   preferred_element_type=jnp.float32) / math.sqrt(hd) + madd
    mmax = jnp.max(s, axis=-1, keepdims=True)
    p = jnp.exp(s - mmax)
    p = p / jnp.sum(p, axis=-1, keepdims=True)
    o = jnp.einsum("bhqk,bhkd->bhqd", bf(p), bf(v), preferred_element_type=jnp.float32)
    o = o.transpose(0, 2, 1, 3).reshape(B, S, D)
    y = mm(o, params["w_out"])
    h = xf + y

    xm = rms(rms(h, params["norm2_w"]), params["moe_norm_w"])
    logits = mm(xm, params["gate_w"]) + params["gate_b"]
    gp = jax.nn.softmax(logits, axis=-1)
    tp, ti = jax.lax.top_k(gp, K)
    oh = jax.nn.one_hot(ti, E, dtype=jnp.float32)               # (B, S, K, E)
    cw = jnp.sum(oh * tp[..., None], axis=-2)                   # (B, S, E)

    xm_flat = xm.reshape(-1, D)
    cw_flat = cw.reshape(-1, E)
    moe_out = jnp.zeros_like(xm_flat)
    for e in range(E):
        he = mm(xm_flat, params["w1"][e]) + params["b1"][e]
        he = 0.5 * he * (1.0 + jax.lax.erf(he / SQRT2))
        oe = mm(he, params["w2"][e]) + params["b2"][e]
        moe_out = moe_out + cw_flat[:, e:e + 1] * oe
    out = h + moe_out.reshape(B, S, D)

    importance = jnp.sum(gp, axis=(0, 1))
    load = jnp.sum(oh, axis=(0, 1, 2))
    bl = 0.5 * (jnp.std(importance / jnp.sum(importance), ddof=1)
                + jnp.std(load / jnp.sum(load), ddof=1))
    return out, bl


# ----------------------------------------------------------------------------
if __name__ == "__main__":
    # small shapes consistent with the module
    B, S, D = 2, 64, 64
    H, L, M, E, K = 4, 32, 128, 6, 2

    key = jax.random.PRNGKey(0)
    ks = jax.random.split(key, 16)

    def rnd(k, shape, scale=0.1):
        return scale * jax.random.normal(k, shape, jnp.float32)

    params = {
        "norm1_w":    1.0 + 0.05 * jax.random.normal(ks[0], (D,), jnp.float32),
        "w_q":        rnd(ks[1], (D, D)),
        "w_dk":       rnd(ks[2], (D, L)),
        "w_dv":       rnd(ks[3], (D, L)),
        "w_uk":       rnd(ks[4], (L, D)),
        "w_uv":       rnd(ks[5], (L, D)),
        "w_out":      rnd(ks[6], (D, D)),
        "norm2_w":    1.0 + 0.05 * jax.random.normal(ks[7], (D,), jnp.float32),
        "moe_norm_w": 1.0 + 0.05 * jax.random.normal(ks[8], (D,), jnp.float32),
        "gate_w":     rnd(ks[9], (D, E)),
        "gate_b":     rnd(ks[10], (E,)),
        "w1":         rnd(ks[11], (E, D, M)),
        "b1":         rnd(ks[12], (E, M)),
        "w2":         rnd(ks[13], (E, M, D)),
        "b2":         rnd(ks[14], (E, D)),
    }
    # TODO(synk): Dropout layers (attn / gate / expert) are identity at inference;
    # training-time dropout masks are not reproduced in the kernels.

    x = jax.random.normal(ks[15], (B, S, D), jnp.float32)
    mask = jnp.tril(jnp.ones((S, S), dtype=jnp.bool_))          # causal attention mask

    out, loss = latent_gpt_block_forward(
        x, mask, params, num_heads=H, experts_per_token=K, causal=True)
    out, loss = jax.block_until_ready((out, loss))

    ref_out, ref_loss = latent_gpt_block_ref(
        x, mask, params, num_heads=H, experts_per_token=K)

    assert out.shape == (B, S, D)
    max_diff = float(jnp.max(jnp.abs(out - ref_out)))
    assert jnp.allclose(out, ref_out, atol=5e-3, rtol=5e-3), (
        f"output mismatch vs reference (max abs diff {max_diff})")
    assert jnp.allclose(loss, ref_loss, atol=1e-3, rtol=1e-2), "loss mismatch vs reference"

    print("KERNEL_OK")
</pallas_src>

<mosaic_0001>
module attributes {stable_mosaic.version = 11 : i64} {
  func.func @qkv_rope_kernel(%arg0: i32, %arg1: i32, %arg2: memref<64x64xf32, #tpu.memory_space<vmem>>, %arg3: memref<1x64xf32, #tpu.memory_space<vmem>>, %arg4: memref<64x64xf32, #tpu.memory_space<vmem>>, %arg5: memref<64x64xf32, #tpu.memory_space<vmem>>, %arg6: memref<64x64xbf16, #tpu.memory_space<vmem>>, %arg7: memref<64x32xbf16, #tpu.memory_space<vmem>>, %arg8: memref<64x32xbf16, #tpu.memory_space<vmem>>, %arg9: memref<32x64xbf16, #tpu.memory_space<vmem>>, %arg10: memref<32x64xbf16, #tpu.memory_space<vmem>>, %arg11: memref<64x64xbf16, #tpu.memory_space<vmem>>, %arg12: memref<64x64xbf16, #tpu.memory_space<vmem>>, %arg13: memref<64x64xbf16, #tpu.memory_space<vmem>>) attributes {dimension_semantics = [#tpu.dimension_semantics<parallel>, #tpu.dimension_semantics<parallel>], iteration_bounds = array<i64: 2, 1>, scalar_prefetch = 0 : i64, scratch_operands = 0 : i64, tpu.core_type = #tpu.core_type<tc>, window_params = [{transform_indices = @transform_0, window_bounds = array<i64: 64, 64>}, {pipeline_mode = #tpu.pipeline_mode<synchronous>, transform_indices = @transform_1, window_bounds = array<i64: 1, 64>}, {transform_indices = @transform_2, window_bounds = array<i64: 64, 64>}, {transform_indices = @transform_3, window_bounds = array<i64: 64, 64>}, {pipeline_mode = #tpu.pipeline_mode<synchronous>, transform_indices = @transform_4, window_bounds = array<i64: 64, 64>}, {pipeline_mode = #tpu.pipeline_mode<synchronous>, transform_indices = @transform_5, window_bounds = array<i64: 64, 32>}, {pipeline_mode = #tpu.pipeline_mode<synchronous>, transform_indices = @transform_6, window_bounds = array<i64: 64, 32>}, {pipeline_mode = #tpu.pipeline_mode<synchronous>, transform_indices = @transform_7, window_bounds = array<i64: 32, 64>}, {pipeline_mode = #tpu.pipeline_mode<synchronous>, transform_indices = @transform_8, window_bounds = array<i64: 32, 64>}, {transform_indices = @transform_9, window_bounds = array<i64: 64, 64>}, {transform_indices = @transform_10, window_bounds = array<i64: 64, 64>}, {transform_indices = @transform_11, window_bounds = array<i64: 64, 64>}]} {
    %c0 = arith.constant 0 : index
    %c0_0 = arith.constant 0 : index
    %0 = vector.load %arg2[%c0, %c0_0] : memref<64x64xf32, #tpu.memory_space<vmem>>, vector<64x64xf32>
    %c0_1 = arith.constant 0 : index
    %c0_2 = arith.constant 0 : index
    %1 = vector.load %arg3[%c0_1, %c0_2] : memref<1x64xf32, #tpu.memory_space<vmem>>, vector<1x64xf32>
    %2 = vector.broadcast %1 : vector<1x64xf32> to vector<64x64xf32>
    %3 = arith.mulf %2, %0 : vector<64x64xf32>
    %4 = arith.mulf %0, %0 : vector<64x64xf32>
    %cst = arith.constant dense<0.000000e+00> : vector<64xf32>
    %5 = vector.multi_reduction <add>, %4, %cst [1] : vector<64x64xf32> to vector<64xf32>
    %6 = vector.shape_cast %5 : vector<64xf32> to vector<64x1xf32>
    %cst_3 = arith.constant 6.400000e+01 : f32
    %7 = vector.broadcast %cst_3 : f32 to vector<64x1xf32>
    %8 = arith.divf %6, %7 : vector<64x1xf32>
    %cst_4 = arith.constant 9.99999997E-7 : f32
    %9 = vector.broadcast %cst_4 : f32 to vector<64x1xf32>
    %10 = arith.addf %8, %9 : vector<64x1xf32>
    %11 = math.rsqrt %10 : vector<64x1xf32>
    %12 = vector.broadcast %11 : vector<64x1xf32> to vector<64x64xf32>
    %13 = arith.mulf %3, %12 : vector<64x64xf32>
    %14 = arith.truncf %13 : vector<64x64xf32> to vector<64x64xbf16>
    %c0_5 = arith.constant 0 : index
    %c0_6 = arith.constant 0 : index
    %15 = vector.load %arg6[%c0_5, %c0_6] : memref<64x64xbf16, #tpu.memory_space<vmem>>, vector<64x64xbf16>
    %cst_7 = arith.constant dense<0.000000e+00> : vector<64x64xf32>
    %16 = tpu.matmul %14, %15, %cst_7 {dimension_numbers = #tpu.dot_dimension_numbers<[1], [0], [0], [1], [0, 0, 1, 1], [], []>} : vector<64x64xbf16>, vector<64x64xbf16>, vector<64x64xf32> -> vector<64x64xf32>
    %c0_8 = arith.constant 0 : index
    %c0_9 = arith.constant 0 : index
    %17 = vector.load %arg7[%c0_8, %c0_9] : memref<64x32xbf16, #tpu.memory_space<vmem>>, vector<64x32xbf16>
    %cst_10 = arith.constant dense<0.000000e+00> : vector<64x32xf32>
    %18 = tpu.matmul %14, %17, %cst_10 {dimension_numbers = #tpu.dot_dimension_numbers<[1], [0], [0], [1], [0, 0, 1, 1], [], []>} : vector<64x64xbf16>, vector<64x32xbf16>, vector<64x32xf32> -> vector<64x32xf32>
    %c0_11 = arith.constant 0 : index
    %c0_12 = arith.constant 0 : index
    %19 = vector.load %arg8[%c0_11, %c0_12] : memref<64x32xbf16, #tpu.memory_space<vmem>>, vector<64x32xbf16>
    %cst_13 = arith.constant dense<0.000000e+00> : vector<64x32xf32>
    %20 = tpu.matmul %14, %19, %cst_13 {dimension_numbers = #tpu.dot_dimension_numbers<[1], [0], [0], [1], [0, 0, 1, 1], [], []>} : vector<64x64xbf16>, vector<64x32xbf16>, vector<64x32xf32> -> vector<64x32xf32>
    %21 = arith.truncf %18 : vector<64x32xf32> to vector<64x32xbf16>
    %c0_14 = arith.constant 0 : index
    %c0_15 = arith.constant 0 : index
    %22 = vector.load %arg9[%c0_14, %c0_15] : memref<32x64xbf16, #tpu.memory_space<vmem>>, vector<32x64xbf16>
    %cst_16 = arith.constant dense<0.000000e+00> : vector<64x64xf32>
    %23 = tpu.matmul %21, %22, %cst_16 {dimension_numbers = #tpu.dot_dimension_numbers<[1], [0], [0], [1], [0, 0, 1, 1], [], []>} : vector<64x32xbf16>, vector<32x64xbf16>, vector<64x64xf32> -> vector<64x64xf32>
    %24 = arith.truncf %20 : vector<64x32xf32> to vector<64x32xbf16>
    %c0_17 = arith.constant 0 : index
    %c0_18 = arith.constant 0 : index
    %25 = vector.load %arg10[%c0_17, %c0_18] : memref<32x64xbf16, #tpu.memory_space<vmem>>, vector<32x64xbf16>
    %cst_19 = arith.constant dense<0.000000e+00> : vector<64x64xf32>
    %26 = tpu.matmul %24, %25, %cst_19 {dimension_numbers = #tpu.dot_dimension_numbers<[1], [0], [0], [1], [0, 0, 1, 1], [], []>} : vector<64x32xbf16>, vector<32x64xbf16>, vector<64x64xf32> -> vector<64x64xf32>
    %c0_20 = arith.constant 0 : index
    %c0_21 = arith.constant 0 : index
    %27 = vector.load %arg4[%c0_20, %c0_21] : memref<64x64xf32, #tpu.memory_space<vmem>>, vector<64x64xf32>
    %c0_22 = arith.constant 0 : index
    %c0_23 = arith.constant 0 : index
    %28 = vector.load %arg5[%c0_22, %c0_23] : memref<64x64xf32, #tpu.memory_space<vmem>>, vector<64x64xf32>
    %29 = vector.extract_strided_slice %16 {offsets = [0, 8], sizes = [64, 8], strides = [1, 1]} : vector<64x64xf32> to vector<64x8xf32>
    %cst_24 = arith.constant 0.000000e+00 : f32
    %30 = vector.broadcast %cst_24 : f32 to vector<64x8xf32>
    %31 = arith.subf %30, %29 : vector<64x8xf32>
    %32 = vector.extract_strided_slice %16 {offsets = [0, 0], sizes = [64, 8], strides = [1, 1]} : vector<64x64xf32> to vector<64x8xf32>
    %33 = vector.extract_strided_slice %16 {offsets = [0, 24], sizes = [64, 8], strides = [1, 1]} : vector<64x64xf32> to vector<64x8xf32>
    %cst_25 = arith.constant 0.000000e+00 : f32
    %34 = vector.broadcast %cst_25 : f32 to vector<64x8xf32>
    %35 = arith.subf %34, %33 : vector<64x8xf32>
    %36 = vector.extract_strided_slice %16 {offsets = [0, 16], sizes = [64, 8], strides = [1, 1]} : vector<64x64xf32> to vector<64x8xf32>
    %37 = vector.extract_strided_slice %16 {offsets = [0, 40], sizes = [64, 8], strides = [1, 1]} : vector<64x64xf32> to vector<64x8xf32>
    %cst_26 = arith.constant 0.000000e+00 : f32
    %38 = vector.broadcast %cst_26 : f32 to vector<64x8xf32>
    %39 = arith.subf %38, %37 : vector<64x8xf32>
    %40 = vector.extract_strided_slice %16 {offsets = [0, 32], sizes = [64, 8], strides = [1, 1]} : vector<64x64xf32> to vector<64x8xf32>
    %41 = vector.extract_strided_slice %16 {offsets = [0, 56], sizes = [64, 8], strides = [1, 1]} : vector<64x64xf32> to vector<64x8xf32>
    %cst_27 = arith.constant 0.000000e+00 : f32
    %42 = vector.broadcast %cst_27 : f32 to vector<64x8xf32>
    %43 = arith.subf %42, %41 : vector<64x8xf32>
    %44 = vector.extract_strided_slice %16 {offsets = [0, 48], sizes = [64, 8], strides = [1, 1]} : vector<64x64xf32> to vector<64x8xf32>
    %45 = tpu.concatenate %31, %32, %35, %36, %39, %40, %43, %44 in 1 : vector<64x8xf32>, vector<64x8xf32>, vector<64x8xf32>, vector<64x8xf32>, vector<64x8xf32>, vector<64x8xf32>, vector<64x8xf32>, vector<64x8xf32> -> vector<64x64xf32>
    %46 = arith.mulf %16, %28 : vector<64x64xf32>
    %47 = arith.mulf %45, %27 : vector<64x64xf32>
    %48 = arith.addf %46, %47 : vector<64x64xf32>
    %49 = arith.truncf %48 : vector<64x64xf32> to vector<64x64xbf16>
    %c0_28 = arith.constant 0 : index
    %c0_29 = arith.constant 0 : index
    %50 = vector.load %arg11[%c0_28, %c0_29] : memref<64x64xbf16, #tpu.memory_space<vmem>>, vector<64x64xbf16>
    tpu.vector_store %arg11[%c0_28, %c0_29], %49 {strides = array<i32>} : memref<64x64xbf16, #tpu.memory_space<vmem>>, vector<64x64xbf16>,
    %51 = vector.extract_strided_slice %23 {offsets = [0, 8], sizes = [64, 8], strides = [1, 1]} : vector<64x64xf32> to vector<64x8xf32>
    %cst_30 = arith.constant 0.000000e+00 : f32
    %52 = vector.broadcast %cst_30 : f32 to vector<64x8xf32>
    %53 = arith.subf %52, %51 : vector<64x8xf32>
    %54 = vector.extract_strided_slice %23 {offsets = [0, 0], sizes = [64, 8], strides = [1, 1]} : vector<64x64xf32> to vector<64x8xf32>
    %55 = vector.extract_strided_slice %23 {offsets = [0, 24], sizes = [64, 8], strides = [1, 1]} : vector<64x64xf32> to vector<64x8xf32>
    %cst_31 = arith.constant 0.000000e+00 : f32
    %56 = vector.broadcast %cst_31 : f32 to vector<64x8xf32>
    %57 = arith.subf %56, %55 : vector<64x8xf32>
    %58 = vector.extract_strided_slice %23 {offsets = [0, 16], sizes = [64, 8], strides = [1, 1]} : vector<64x64xf32> to vector<64x8xf32>
    %59 = vector.extract_strided_slice %23 {offsets = [0, 40], sizes = [64, 8], strides = [1, 1]} : vector<64x64xf32> to vector<64x8xf32>
    %cst_32 = arith.constant 0.000000e+00 : f32
    %60 = vector.broadcast %cst_32 : f32 to vector<64x8xf32>
    %61 = arith.subf %60, %59 : vector<64x8xf32>
    %62 = vector.extract_strided_slice %23 {offsets = [0, 32], sizes = [64, 8], strides = [1, 1]} : vector<64x64xf32> to vector<64x8xf32>
    %63 = vector.extract_strided_slice %23 {offsets = [0, 56], sizes = [64, 8], strides = [1, 1]} : vector<64x64xf32> to vector<64x8xf32>
    %cst_33 = arith.constant 0.000000e+00 : f32
    %64 = vector.broadcast %cst_33 : f32 to vector<64x8xf32>
    %65 = arith.subf %64, %63 : vector<64x8xf32>
    %66 = vector.extract_strided_slice %23 {offsets = [0, 48], sizes = [64, 8], strides = [1, 1]} : vector<64x64xf32> to vector<64x8xf32>
    %67 = tpu.concatenate %53, %54, %57, %58, %61, %62, %65, %66 in 1 : vector<64x8xf32>, vector<64x8xf32>, vector<64x8xf32>, vector<64x8xf32>, vector<64x8xf32>, vector<64x8xf32>, vector<64x8xf32>, vector<64x8xf32> -> vector<64x64xf32>
    %68 = arith.mulf %23, %28 : vector<64x64xf32>
    %69 = arith.mulf %67, %27 : vector<64x64xf32>
    %70 = arith.addf %68, %69 : vector<64x64xf32>
    %71 = arith.truncf %70 : vector<64x64xf32> to vector<64x64xbf16>
    %c0_34 = arith.constant 0 : index
    %c0_35 = arith.constant 0 : index
    %72 = vector.load %arg12[%c0_34, %c0_35] : memref<64x64xbf16, #tpu.memory_space<vmem>>, vector<64x64xbf16>
    tpu.vector_store %arg12[%c0_34, %c0_35], %71 {strides = array<i32>} : memref<64x64xbf16, #tpu.memory_space<vmem>>, vector<64x64xbf16>,
    %73 = arith.truncf %26 : vector<64x64xf32> to vector<64x64xbf16>
    %c0_36 = arith.constant 0 : index
    %c0_37 = arith.constant 0 : index
    %74 = vector.load %arg13[%c0_36, %c0_37] : memref<64x64xbf16, #tpu.memory_space<vmem>>, vector<64x64xbf16>
    tpu.vector_store %arg13[%c0_36, %c0_37], %73 {strides = array<i32>} : memref<64x64xbf16, #tpu.memory_space<vmem>>, vector<64x64xbf16>,
    return
  }
  func.func @transform_0(%arg0: i32, %arg1: i32) -> (i32, i32) {
    %c1_i32 = arith.constant 1 : i32
    %0 = arith.muli %arg0, %c1_i32 : i32
    %1 = arith.addi %0, %arg1 : i32
    %c0_i32 = arith.constant 0 : i32
    %c0_i32_0 = arith.constant 0 : i32
    return %1, %c0_i32 : i32, i32
  }
  func.func @transform_1(%arg0: i32, %arg1: i32) -> (i32, i32) {
    %c0_i32 = arith.constant 0 : i32
    %c0_i32_0 = arith.constant 0 : i32
    %c0_i32_1 = arith.constant 0 : i32
    return %c0_i32, %c0_i32_0 : i32, i32
  }
  func.func @transform_2(%arg0: i32, %arg1: i32) -> (i32, i32) {
    %c0_i32 = arith.constant 0 : i32
    %c0_i32_0 = arith.constant 0 : i32
    return %arg1, %c0_i32 : i32, i32
  }
  func.func @transform_3(%arg0: i32, %arg1: i32) -> (i32, i32) {
    %c0_i32 = arith.constant 0 : i32
    %c0_i32_0 = arith.constant 0 : i32
    return %arg1, %c0_i32 : i32, i32
  }
  func.func @transform_4(%arg0: i32, %arg1: i32) -> (i32, i32) {
    %c0_i32 = arith.constant 0 : i32
    %c0_i32_0 = arith.constant 0 : i32
    %c0_i32_1 = arith.constant 0 : i32
    return %c0_i32, %c0_i32_0 : i32, i32
  }
  func.func @transform_5(%arg0: i32, %arg1: i32) -> (i32, i32) {
    %c0_i32 = arith.constant 0 : i32
    %c0_i32_0 = arith.constant 0 : i32
    %c0_i32_1 = arith.constant 0 : i32
    return %c0_i32, %c0_i32_0 : i32, i32
  }
  func.func @transform_6(%arg0: i32, %arg1: i32) -> (i32, i32) {
    %c0_i32 = arith.constant 0 : i32
    %c0_i32_0 = arith.constant 0 : i32
    %c0_i32_1 = arith.constant 0 : i32
    return %c0_i32, %c0_i32_0 : i32, i32
  }
  func.func @transform_7(%arg0: i32, %arg1: i32) -> (i32, i32) {
    %c0_i32 = arith.constant 0 : i32
    %c0_i32_0 = arith.constant 0 : i32
    %c0_i32_1 = arith.constant 0 : i32
    return %c0_i32, %c0_i32_0 : i32, i32
  }
  func.func @transform_8(%arg0: i32, %arg1: i32) -> (i32, i32) {
    %c0_i32 = arith.constant 0 : i32
    %c0_i32_0 = arith.constant 0 : i32
    %c0_i32_1 = arith.constant 0 : i32
    return %c0_i32, %c0_i32_0 : i32, i32
  }
  func.func @transform_9(%arg0: i32, %arg1: i32) -> (i32, i32) {
    %c1_i32 = arith.constant 1 : i32
    %0 = arith.muli %arg0, %c1_i32 : i32
    %1 = arith.addi %0, %arg1 : i32
    %c0_i32 = arith.constant 0 : i32
    %c0_i32_0 = arith.constant 0 : i32
    return %1, %c0_i32 : i32, i32
  }
  func.func @transform_10(%arg0: i32, %arg1: i32) -> (i32, i32) {
    %c1_i32 = arith.constant 1 : i32
    %0 = arith.muli %arg0, %c1_i32 : i32
    %1 = arith.addi %0, %arg1 : i32
    %c0_i32 = arith.constant 0 : i32
    %c0_i32_0 = arith.constant 0 : i32
    return %1, %c0_i32 : i32, i32
  }
  func.func @transform_11(%arg0: i32, %arg1: i32) -> (i32, i32) {
    %c1_i32 = arith.constant 1 : i32
    %0 = arith.muli %arg0, %c1_i32 : i32
    %1 = arith.addi %0, %arg1 : i32
    %c0_i32 = arith.constant 0 : i32
    %c0_i32_0 = arith.constant 0 : i32
    return %1, %c0_i32 : i32, i32
  }
}

</mosaic_0001>

<bundles_post_ra>
// kernel: tpu_custom_call.1
= control target key start
LH: loop header
LB: loop body
LE: loop exit
PB: predicated region body
PF: predicated region fallthrough
CT: control target
= control target key end

     0   :  { %s1787_s17 = smov 0   ;;  %s1789_s18 = smov 0   ;;  %s2459_s0 = inlined_call_operand.vmem [shape: f32[128,64], index: 0, kind: input, shape index: {}]   ;;  %s2460_s1 = inlined_call_operand.vmem [shape: f32[1,64], index: 1, kind: input, shape index: {}]   ;;  %s2461_s2 = inlined_call_operand.vmem [shape: f32[64,64], index: 2, kind: input, shape index: {}]   ;;  %s2462_s3 = inlined_call_operand.vmem [shape: f32[64,64], index: 3, kind: input, shape index: {}]   ;;  %s2463_s4 = inlined_call_operand.vmem [shape: bf16[64,64], index: 4, kind: input, shape index: {}]   ;;  %s2464_s5 = inlined_call_operand.vmem [shape: bf16[64,32], index: 5, kind: input, shape index: {}]   ;;  %s2465_s6 = inlined_call_operand.vmem [shape: bf16[64,32], index: 6, kind: input, shape index: {}]   ;;  %s2466_s7 = inlined_call_operand.vmem [shape: bf16[32,64], index: 7, kind: input, shape index: {}]   ;;  %s2467_s8 = inlined_call_operand.vmem [shape: bf16[32,64], index: 8, kind: input, shape index: {}]   ;;  %s2468_s9 = inlined_call_operand.vmem [shape: bf16[128,64], index: 9, kind: output, shape index: {0}]   ;;  %s2469_s10 = inlined_call_operand.vmem [shape: bf16[128,64], index: 10, kind: output, shape index: {1}]   ;;  %s2470_s11 = inlined_call_operand.vmem [shape: bf16[128,64], index: 11, kind: output, shape index: {2}]  }
   0x1   :  { %s1791_s19 = smov 0  }
   0x2 LB: > { %s34_s20 = sadd.s32 1, %s1718_s18  ;;  %p1535_p0 = scmp.ge.s32.totalorder %s1722_s19, 1  ;;  %s1722_s19 = sphi %s1791_s19, %s22_s19   ;;  %s1718_s18 = sphi %s1789_s18, %s2482_s18   ;;  %s1714_s17 = sphi %s1787_s17, %s2481_s17  }
   0x3   : > { %p36_p1 = scmp.ge.s32.totalorder %s34_s20, 2  ;;  %p387_p2 = scmp.lt.s32.totalorder %s1722_s19, 3 }
   0x5   : > { %s2484_s20 = smov (%p36_p1, %s34_s20), 0  ;;  %p388_p3 = pnand %p1535_p0, %p387_p2 }
   0x6   : > { %s1536_s21 = sshll.u32 (!%p388_p3), %s1714_s17, 3  ;;  %s1725_s26 = smov (!%p388_p3), 8  }
   0x7   : > { %391 = sbr.rel (%p388_p3) target bundleno = 640 (0x280), region = 56  ;;  %p453_p4 = scmp.lt.s32.totalorder (!%p388_p3), %s1536_s21, 15 }
   0x8   : > { %s1726_s27 = smov (!%p388_p3), 120  }
   0xc   : > { %s2486_s21 = smov (!%p453_p4, %s1536_s21), 15  ;;  %vm524_vm0 = vcmask 523264   ;;  %v1724_v24 = vmov 64.0   ;;  %v1633_v28 = vld [vmem:[%s2463_s4 + $0x18] sm:$0xff]  ;;  %v1632_v31 = vld [vmem:[%s2463_s4 + $0x10] sm:$0xff]  ;;  %v1631_v34 = vld [vmem:[%s2463_s4 + $0x8] sm:$0xff] }
   0xd   : > { %s1537_s22 = sshll.u32 %s2486_s21, 3  ;;  %1682 = vrcp.f32 %v1724_v24  ;;  %v1641_v29 = vld [vmem:[%s2465_s6 + $0x18] sm:$0xff]  ;;  %712 = vmatpush.bf16.msra.mxu0 %v1633_v28  ;;  %1646 = vmatpush.bf16.msra.mxu1 %v1633_v28  ;;  %v1640_v32 = vld [vmem:[%s2465_s6 + $0x10] sm:$0xff]  ;;  %v1639_v35 = vld [vmem:[%s2465_s6 + $0x8] sm:$0xff]  ;;  %s2109_s17 = sshll.u32 %s2486_s21, 2 }
   0xe   : > { %s456_s25 = scalar_lea.vmem %s2459_s0, %s1537_s22  ;;  %834 = vmatpush.bf16.msra.mxu2 %v1641_v29  ;;  %v1630_v37 = vld [vmem:[%s2463_s4] sm:$0xff]  ;;  %v1637_v47 = vld [vmem:[%s2464_s5 + $0x18] sm:$0xff]  ;;  %v1636_v49 = vld [vmem:[%s2464_s5 + $0x10] sm:$0xff]  ;;  %s2119_s24 = scalar_lea.vmem %s2468_s9, %s2109_s17 }
   0xf   : > { %v1811_v0 = vld [vmem:[%s456_s25 + $0x30] sm:$0xff]  ;;  %v1813_v1 = vld [vmem:[%s456_s25] sm:$0xff]  ;;  %v1821_v5 = vld [vmem:[%s456_s25 + $0x38] sm:$0xff]  ;;  %s2328_s12 = scalar_lea.vmem %s2470_s11, %s2109_s17  ;;  %s2362_s13 = scalar_lea.vmem %s2469_s10, %s2109_s17 }
  0x10   : > { %v522_v2 = vmul.f32 %v1811_v0, %v1811_v0  ;;  %v516_v3 = vmul.f32 %v1813_v1, %v1813_v1  ;;  %v1819_v4 = vld [vmem:[%s456_s25 + $0x10] sm:$0xff]  ;;  %v1823_v6 = vld [vmem:[%s456_s25 + $0x8] sm:$0xff]  ;;  %v1829_v10 = vld [vmem:[%s456_s25 + $0x18] sm:$0xff]  ;;  %v523_v11 = vmul.f32 %v1821_v5, %v1821_v5 }
  0x11   : > { %v518_v9 = vmul.f32 %v1819_v4, %v1819_v4  ;;  %v517_v12 = vmul.f32 %v1823_v6, %v1823_v6  ;;  %v519_v14 = vmul.f32 %v1829_v10, %v1829_v10  ;;  %v1840_v17 = vld [vmem:[%s456_s25 + $0x20] sm:$0xff]  ;;  %v1842_v18 = vld [vmem:[%s456_s25 + $0x28] sm:$0xff]  ;;  %713 = vmatpush.bf16.msra.mxu0 %v1632_v31  ;;  %1647 = vmatpush.bf16.msra.mxu1 %v1632_v31 }
  0x12   : > { %v543_v7 = vsel %vm524_vm0, %v522_v2, 0.0  ;;  %v525_v8 = vsel %vm524_vm0, %v516_v3, 0.0  ;;  %v546_v15 = vsel %vm524_vm0, %v523_v11, 0.0  ;;  %v520_v20 = vmul.f32 %v1840_v17, %v1840_v17  ;;  %835 = vmatpush.bf16.msra.mxu2 %v1640_v32  ;;  %v1638_v38 = vld [vmem:[%s2465_s6] sm:$0xff]  ;;  %v1635_v54 = vld [vmem:[%s2464_s5 + $0x8] sm:$0xff] }
  0x13   : > { %544 = vadd.xlane.f32.xlu0 %v543_v7  ;;  %526 = vadd.xlane.f32.xlu1 %v525_v8  ;;  %v531_v13 = vsel %vm524_vm0, %v518_v9, 0.0  ;;  %v528_v16 = vsel %vm524_vm0, %v517_v12, 0.0  ;;  %v534_v19 = vsel %vm524_vm0, %v519_v14, 0.0  ;;  %v521_v21 = vmul.f32 %v1842_v18, %v1842_v18  ;;  %v1683_v25 = vpop.eup %1682  ;;  %v1634_v2 = vld [vmem:[%s2464_s5] sm:$0xff] }
  0x14   : > { %532 = vadd.xlane.f32.xlu2 %v531_v13  ;;  %v537_v22 = vsel %vm524_vm0, %v520_v20, 0.0  ;;  %v550_v26 = vmul.f32 64.0, %v1683_v25  ;;  %vm554_vm1 = vweird.f32 %v1683_v25  ;;  %v1914_v3 = vld [vmem:[%s2460_s1] ss:$0 sm:$0xff] }
  0x15   : > { %v540_v23 = vsel %vm524_vm0, %v521_v21, 0.0  ;;  %714 = vmatpush.bf16.msra.mxu0 %v1631_v34  ;;  %1648 = vmatpush.bf16.msra.mxu1 %v1631_v34  ;;  %v514_v20 = vmul.f32 %v1914_v3, %v1811_v0  ;;  %v1929_v21 = vmul.f32 %v1914_v3, %v1813_v1  ;;  %v510_v0 = vmul.f32 %v1914_v3, %v1819_v4 }
  0x16   : > { %v551_v27 = vsub.f32 1.0, %v550_v26  ;;  %836 = vmatpush.bf16.msra.mxu2 %v1639_v35 }
  0x18   : > { %v552_v30 = vmul.f32 %v1683_v25, %v551_v27 }
  0x19   : > { %715 = vmatpush.bf16.msra.mxu0 %v1630_v37  ;;  %1649 = vmatpush.bf16.msra.mxu1 %v1630_v37 }
  0x1a   : > { %v553_v33 = vadd.f32 %v1683_v25, %v552_v30  ;;  %837 = vmatpush.bf16.msra.mxu2 %v1638_v38  ;;  %v509_v30 = vmul.f32 %v1914_v3, %v1823_v6 }
  0x1b   : > { %547 = vadd.xlane.f32.xlu0 %v546_v15  ;;  %529 = vadd.xlane.f32.xlu1 %v528_v16 }
  0x1c   : > { %535 = vadd.xlane.f32.xlu2 %v534_v19  ;;  %v555_v36 = vsel %vm554_vm1, %v1683_v25, %v553_v33  ;;  %v515_v25 = vmul.f32 %v1914_v3, %v1821_v5 }
  0x1d   : > { %773 = vmatpush.bf16.msrb.mxu1 %v1637_v47 }
  0x21   : > { %774 = vmatpush.bf16.msrb.mxu1 %v1636_v49 }
  0x23   : > { %538 = vadd.xlane.f32.xlu0 %v537_v22  ;;  %541 = vadd.xlane.f32.xlu1 %v540_v23 }
  0x25   : > { %775 = vmatpush.bf16.msrb.mxu1 %v1635_v54 }
  0x29   : > { %776 = vmatpush.bf16.msrb.mxu1 %v1634_v2 }
  0x86   : > { %v545_v39 = vpop.xlane.xlu0 %544  ;;  %v527_v40 = vpop.xlane.xlu1 %526 }
  0x87   : > { %v562_v41 = vmul.f32 %v555_v36, %v545_v39  ;;  %v556_v42 = vmul.f32 %v555_v36, %v527_v40  ;;  %v533_v43 = vpop.xlane.xlu2 %532 }
  0x88   : > { %v558_v46 = vmul.f32 %v555_v36, %v533_v43 }
  0x89   : > { %v1875_v44 = vadd.f32 1e-06, %v562_v41  ;;  %v1877_v45 = vadd.f32 1e-06, %v556_v42 }
  0x8a   : > { %v1883_v48 = vadd.f32 1e-06, %v558_v46 }
  0x8b   : > { %1684 = vrsqrt.f32 %v1875_v44  ;;  %vm638_vm2 = vweird.f32 %v1875_v44  ;;  %vm578_vm3 = vweird.f32 %v1877_v45 }
  0x8c   : > { %1686 = vrsqrt.f32 %v1877_v45  ;;  %vm598_vm6 = vweird.f32 %v1883_v48 }
  0x8d   : > { %1688 = vrsqrt.f32 %v1883_v48 }
  0x8e   : > { %v548_v50 = vpop.xlane.xlu0 %547  ;;  %v530_v51 = vpop.xlane.xlu1 %529 }
  0x8f   : > { %v563_v52 = vmul.f32 %v555_v36, %v548_v50  ;;  %v557_v53 = vmul.f32 %v555_v36, %v530_v51  ;;  %v536_v55 = vpop.xlane.xlu2 %535 }
  0x90   : > { %v559_v59 = vmul.f32 %v555_v36, %v536_v55 }
  0x91   : > { %v1893_v56 = vpop.eup %1684  ;;  %v1895_v57 = vadd.f32 1e-06, %v563_v52  ;;  %v1897_v58 = vadd.f32 1e-06, %v557_v53  ;;  %v511_v53 = vmul.f32 %v1914_v3, %v1829_v10 }
  0x92   : > { %v1899_v60 = vpop.eup %1686  ;;  %v633_v61 = vmul.f32 %v1893_v56, %v1875_v44  ;;  %v1921_v11 = vadd.f32 1e-06, %v559_v59  ;;  %vm639_vm5 = vweird.f32 %v1893_v56 }
  0x93   : > { %v1903_v62 = vpop.eup %1688  ;;  %v573_v63 = vmul.f32 %v1899_v60, %v1877_v45  ;;  %1690 = vrsqrt.f32 %v1895_v57  ;;  %vm579_vm4 = vweird.f32 %v1899_v60  ;;  %vm588_vm8 = vweird.f32 %v1897_v58  ;;  %vm1960_vm10 = vmor %vm638_vm2, %vm639_vm5 }
  0x94   : > { %v634_v7 = vmul.f32 %v1893_v56, %v633_v61  ;;  %1692 = vrsqrt.f32 %v1897_v58  ;;  %v593_v8 = vmul.f32 %v1903_v62, %v1883_v48  ;;  %vm1951_vm7 = vmor %vm578_vm3, %vm579_vm4  ;;  %vm599_vm9 = vweird.f32 %v1903_v62 }
  0x95   : > { %v574_v9 = vmul.f32 %v1899_v60, %v573_v63  ;;  %1694 = vrsqrt.f32 %v1921_v11  ;;  %vm648_vm13 = vweird.f32 %v1895_v57  ;;  %vm1972_vm14 = vmor %vm598_vm6, %vm599_vm9  ;;  %vm608_vm15 = vweird.f32 %v1921_v11 }
  0x96   : > { %v635_v12 = vmul.f32 0.5, %v634_v7  ;;  %v594_v13 = vmul.f32 %v1903_v62, %v593_v8  ;;  %v539_v14 = vpop.xlane.xlu0 %538  ;;  %v542_v15 = vpop.xlane.xlu1 %541 }
  0x97   : > { %v575_v16 = vmul.f32 0.5, %v574_v9  ;;  %v560_v19 = vmul.f32 %v555_v36, %v539_v14  ;;  %v561_v28 = vmul.f32 %v555_v36, %v542_v15 }
  0x98   : > { %v636_v22 = vsub.f32 1.5, %v635_v12  ;;  %v595_v23 = vmul.f32 0.5, %v594_v13 }
  0x99   : > { %v1691_v24 = vpop.eup %1690  ;;  %v576_v26 = vsub.f32 1.5, %v575_v16  ;;  %v1933_v27 = vadd.f32 1e-06, %v560_v19  ;;  %v1949_v35 = vadd.f32 1e-06, %v561_v28 }
  0x9a   : > { %v1693_v29 = vpop.eup %1692  ;;  %v643_v1 = vmul.f32 %v1691_v24, %v1895_v57  ;;  %v637_v31 = vmul.f32 %v1893_v56, %v636_v22  ;;  %v596_v32 = vsub.f32 1.5, %v595_v23  ;;  %vm649_vm11 = vweird.f32 %v1691_v24 }
  0x9b   : > { %v583_v5 = vmul.f32 %v1693_v29, %v1897_v58  ;;  %1696 = vrsqrt.f32 %v1933_v27  ;;  %v1695_v33 = vpop.eup %1694  ;;  %v577_v4 = vmul.f32 %v1899_v60, %v576_v26  ;;  %vm589_vm12 = vweird.f32 %v1693_v29  ;;  %vm650_vm3 = vmor %vm648_vm13, %vm649_vm11 }
  0x9c   : > { %v644_v6 = vmul.f32 %v1691_v24, %v643_v1  ;;  %v603_v38 = vmul.f32 %v1695_v33, %v1921_v11  ;;  %1698 = vrsqrt.f32 %v1949_v35  ;;  %v597_v42 = vmul.f32 %v1903_v62, %v596_v32  ;;  %vm1982_vm1 = vmor %vm588_vm8, %vm589_vm12 }
  0x9d   : > { %v584_v34 = vmul.f32 %v1693_v29, %v583_v5  ;;  %v641_v45 = vsel %vm1960_vm10, %v1893_v56, %v637_v31  ;;  %v581_v49 = vsel %vm1951_vm7, %v1899_v60, %v577_v4  ;;  %vm609_vm2 = vweird.f32 %v1695_v33 }
  0x9e   : > { %v645_v37 = vmul.f32 0.5, %v644_v6  ;;  %v604_v43 = vmul.f32 %v1695_v33, %v603_v38  ;;  %v658_v55 = vmul.f32 %v641_v45, %v514_v20  ;;  %vm618_vm4 = vweird.f32 %v1933_v27  ;;  %vm1996_vm5 = vmor %vm608_vm15, %vm609_vm2 }
  0x9f   : > { %v585_v40 = vmul.f32 0.5, %v584_v34  ;;  %v601_v59 = vsel %vm1972_vm14, %v1903_v62, %v597_v42  ;;  %v652_v63 = vmul.f32 %v581_v49, %v1929_v21  ;;  %vm628_vm8 = vweird.f32 %v1949_v35  ;;  %v1645_v49 = vld [vmem:[%s2467_s8 + $0x8] sm:$0xff] }
  0xa0   : > { %v646_v41 = vsub.f32 1.5, %v645_v37  ;;  %v605_v52 = vmul.f32 0.5, %v604_v43  ;;  %v654_v13 = vmul.f32 %v601_v59, %v510_v0  ;;  %v512_v22 = vmul.f32 %v1914_v3, %v1840_v17  ;;  %v1643_v17 = vld [vmem:[%s2466_s7 + $0x8] sm:$0xff] }
  0xa1   : > { %v1697_v46 = vpop.eup %1696  ;;  %v586_v44 = vsub.f32 1.5, %v585_v40  ;;  %v513_v26 = vmul.f32 %v1914_v3, %v1842_v18  ;;  %898 = vmatpush.bf16.msrb.mxu0 %v1643_v17  ;;  %1650 = vmatpush.bf16.msrb.mxu2 %v1643_v17  ;;  %v1642_v18 = vld [vmem:[%s2466_s7] sm:$0xff]  ;;  %vm1070_vm11 = vcmask 64512   ;;  %vm1079_vm12 = vcmask 130048  }
  0xa2   : > { %v647_v50 = vmul.f32 %v1691_v24, %v646_v41  ;;  %v613_v48 = vmul.f32 %v1697_v46, %v1933_v27  ;;  %v606_v56 = vsub.f32 1.5, %v605_v52  ;;  %v1699_v60 = vpop.eup %1698  ;;  %vm619_vm6 = vweird.f32 %v1697_v46  ;;  %1651 = vmatpush.bf16.msra.mxu3 %v1643_v17  ;;  %v2134_v17 = vld [vmem:[%s2461_s2 + $0x30] sm:$0xff] }
  0xa3   : > { %v587_v54 = vmul.f32 %v1693_v29, %v586_v44  ;;  %v623_v12 = vmul.f32 %v1699_v60, %v1949_v35  ;;  %vm620_vm7 = vmor %vm618_vm4, %vm619_vm6  ;;  %vm629_vm9 = vweird.f32 %v1699_v60  ;;  %vm1088_vm13 = vcmask 195584  }
  0xa4   : > { %v651_v57 = vsel %vm650_vm3, %v1691_v24, %v647_v50  ;;  %v614_v58 = vmul.f32 %v1697_v46, %v613_v48  ;;  %v607_v7 = vmul.f32 %v1695_v33, %v606_v56  ;;  %vm630_vm10 = vmor %vm628_vm8, %vm629_vm9  ;;  %v1644_v50 = vld [vmem:[%s2467_s8] sm:$0xff]  ;;  %vm1105_vm14 = vcmask 326656  }
  0xa5   : > { %v591_v10 = vsel %vm1982_vm1, %v1693_v29, %v587_v54  ;;  %v659_v2 = vmul.f32 %v651_v57, %v515_v25  ;;  %v624_v15 = vmul.f32 %v1699_v60, %v623_v12  ;;  %899 = vmatpush.bf16.msrb.mxu0 %v1642_v18  ;;  %1652 = vmatpush.bf16.msrb.mxu2 %v1642_v18  ;;  %vm1114_vm15 = vcmask 392192  }
  0xa6   : > { %v653_v8 = vmul.f32 %v591_v10, %v509_v30  ;;  %v615_v9 = vmul.f32 0.5, %v614_v58  ;;  %v611_v16 = vsel %vm1996_vm5, %v1695_v33, %v607_v7  ;;  %1653 = vmatpush.bf16.msra.mxu3 %v1642_v18  ;;  %vm1123_vm1 = vcmask 457728  }
  0xa7   : > { %v663_v62 = vpack.c.bf16 %v659_v2, %v658_v55  ;;  %v655_v19 = vmul.f32 %v611_v16, %v511_v53  ;;  %v625_v21 = vmul.f32 0.5, %v624_v15  ;;  %vm1164_vm2 = vcmask 519168  }
  0xa8   : > { %v660_v14 = vpack.c.bf16 %v653_v8, %v652_v63  ;;  %v616_v11 = vsub.f32 1.5, %v615_v9 }
  0xa9   : > { %1563 = vmatmul.msk.bf16.vlgmr.msra.gmra.mxu1 %vm524_vm0, %v663_v62  ;;  %v661_v23 = vpack.c.bf16 %v655_v19, %v654_v13  ;;  %v626_v24 = vsub.f32 1.5, %v625_v21  ;;  %v2098_v13 = vld [vmem:[%s2462_s3] sm:$0xff] }
  0xaa   : > { %1560 = vmatmul.msk.bf16.vlgmr.msra.gmra.mxu0 %vm524_vm0, %v660_v14  ;;  %1600 = vmatmul.msk.bf16.vlgmr.msra.gmra.mxu2 %vm524_vm0, %v660_v14  ;;  %v617_v20 = vmul.f32 %v1697_v46, %v616_v11 }
  0xab   : > { %v627_v27 = vmul.f32 %v1699_v60, %v626_v24  ;;  %959 = vmatpush.bf16.msrb.mxu3 %v1645_v49 }
  0xac   : > { %v621_v25 = vsel %vm620_vm7, %v1697_v46, %v617_v20 }
  0xad   : > { %v656_v28 = vmul.f32 %v621_v25, %v512_v22  ;;  %v631_v29 = vsel %vm630_vm10, %v1699_v60, %v627_v27 }
  0xae   : > { %v657_v30 = vmul.f32 %v631_v29, %v513_v26 }
  0xaf   : > { %960 = vmatpush.bf16.msrb.mxu3 %v1644_v50 }
  0xb0   : > { %v662_v0 = vpack.c.bf16 %v657_v30, %v656_v28 }
  0xb9   : > { %1580 = vmatmul.msk.bf16.vlgmr.msrb.gmra.mxu1 %vm524_vm0, %v660_v14  ;;  %v2103_v14 = vld [vmem:[%s2461_s2] sm:$0xff] }
  0xba   : > { %1561 = vmatmul.msk.bf16.gmra.mxu0 %vm524_vm0, %v661_v23  ;;  %1601 = vmatmul.msk.bf16.gmra.mxu2 %vm524_vm0, %v661_v23 }
  0xc9   : > { %1581 = vmatmul.msk.bf16.gmra.mxu1 %vm524_vm0, %v661_v23 }
  0xca   : > { %1562 = vmatmul.msk.bf16.gmra.mxu0 %vm524_vm0, %v662_v0  ;;  %1602 = vmatmul.msk.bf16.gmra.mxu2 %vm524_vm0, %v662_v0 }
  0xd9   : > { %1582 = vmatmul.msk.bf16.gmra.mxu1 %vm524_vm0, %v662_v0  ;;  %v2127_v0 = vld [vmem:[%s2462_s3 + $0x30] sm:$0xff] }
  0xda   : > { %1603 = vmatmul.msk.bf16.gmra.mxu2 %vm524_vm0, %v663_v62 }
  0xe9   : > { %1583 = vmatmul.msk.bf16.gmra.mxu1 %vm524_vm0, %v663_v62  ;;  %vm879_vm0 = vcmask 261120  }
 0x126   : > { %v2031_v3 = vpop.f32.mrf.mxu1 }
 0x127   : > { %v2033_v1 = vpop.f32.mrf.mxu0  ;;  %v1004_v5 = vsub.f32 0.0, %v2031_v3 }
 0x128   : > { %1046 = vrot.lane.b32.xlu2 %v2033_v1, %s1725_s26  ;;  %v998_v33 = vsub.f32 0.0, %v2033_v1  ;;  %v1132_v20 = vmul.f32 %v2098_v13, %v2033_v1 }
 0x129   : > { %1026 = vrot.lane.b32.xlu1 %v1004_v5, %s1726_s27 }
 0x12d   : > { %v839_v53 = vpop.f32.mrf.mxu2 }
 0x12e   : > { %v2039_v31 = vpop.f32.mrf.mxu1 }
 0x12f   : > { %v2041_v6 = vpop.f32.mrf.mxu0  ;;  %v1005_v35 = vsub.f32 0.0, %v2039_v31 }
 0x130   : > { %v999_v32 = vsub.f32 0.0, %v2041_v6  ;;  %1058 = vrot.lane.b32.xlu2 %v2031_v3, %s1725_s26 }
 0x131   : > { %1048 = vrot.lane.b32.xlu1 %v2041_v6, %s1725_s26 }
 0x132   : > { %1016 = vrot.lane.b32.xlu0 %v999_v32, %s1726_s27 }
 0x135   : > { %v841_v57 = vpop.f32.mrf.mxu2 }
 0x136   : > { %v778_v4 = vpop.f32.mrf.mxu1  ;;  %v921_v59 = vpack.c.bf16 %v841_v57, %v839_v53  ;;  %v2175_v57 = vld [vmem:[%s2461_s2 + $0x8] sm:$0xff] }
 0x137   : > { %v2050_v34 = vpop.f32.mrf.mxu0 }
 0x138   : > { %1014 = vrot.lane.b32.xlu2 %v998_v33, %s1726_s27  ;;  %v1000_v37 = vsub.f32 0.0, %v2050_v34 }
 0x139   : > { %1060 = vrot.lane.b32.xlu1 %v2039_v31, %s1725_s26 }
 0x13a   : > { %1028 = vrot.lane.b32.xlu0 %v1005_v35, %s1726_s27 }
 0x13d   : > { %v844_v58 = vpop.f32.mrf.mxu2 }
 0x13e   : > { %v780_v36 = vpop.f32.mrf.mxu1 }
 0x13f   : > { %v2058_v38 = vpop.f32.mrf.mxu0  ;;  %v859_v39 = vpack.c.bf16 %v780_v36, %v778_v4  ;;  %v1138_v4 = vmul.f32 %v2127_v0, %v2031_v3 }
 0x140   : > { %1052 = vrot.lane.b32.xlu2 %v2058_v38, %s1725_s26  ;;  %v1001_v40 = vsub.f32 0.0, %v2058_v38 }
 0x141   : > { %1612 = vmatmul.msk.bf16.vlgmr.msrb.gmra.mxu0 %vm879_vm0, %v859_v39  ;;  %1018 = vrot.lane.b32.xlu1 %v1000_v37, %s1726_s27 }
 0x142   : > { %1050 = vrot.lane.b32.xlu0 %v2050_v34, %s1725_s26 }
 0x145   : > { %v846_v61 = vpop.f32.mrf.mxu2 }
 0x146   : > { %v783_v41 = vpop.f32.mrf.mxu1  ;;  %v922_v2 = vpack.c.bf16 %v846_v61, %v844_v58 }
 0x147   : > { %v2067_v42 = vpop.f32.mrf.mxu0 }
 0x148   : > { %v1002_v43 = vsub.f32 0.0, %v2067_v42  ;;  %1020 = vrot.lane.b32.xlu2 %v1001_v40, %s1726_s27 }
 0x149   : > { %1054 = vrot.lane.b32.xlu1 %v2067_v42, %s1725_s26 }
 0x14a   : > { %1022 = vrot.lane.b32.xlu0 %v1002_v43, %s1726_s27 }
 0x14d   : > { %v849_v63 = vpop.f32.mrf.mxu2 }
 0x14e   : > { %v785_v45 = vpop.f32.mrf.mxu1 }
 0x14f   : > { %v2074_v46 = vpop.f32.mrf.mxu0  ;;  %v860_v44 = vpack.c.bf16 %v785_v45, %v783_v41 }
 0x150   : > { %v1003_v47 = vsub.f32 0.0, %v2074_v46 }
 0x151   : > { %1613 = vmatmul.msk.bf16.gmra.mxu0 %vm879_vm0, %v860_v44 }
 0x152   : > { %1056 = vrot.lane.b32.xlu0 %v2074_v46, %s1725_s26  ;;  %1024 = vrot.lane.b32.xlu2 %v1003_v47, %s1726_s27 }
 0x155   : > { %v851_v15 = vpop.f32.mrf.mxu2 }
 0x156   : > { %v788_v51 = vpop.f32.mrf.mxu1  ;;  %v923_v29 = vpack.c.bf16 %v851_v15, %v849_v63 }
 0x15d   : > { %v854_v5 = vpop.f32.mrf.mxu2 }
 0x15e   : > { %v790_v52 = vpop.f32.mrf.mxu1 }
 0x15f   : > { %v861_v48 = vpack.c.bf16 %v790_v52, %v788_v51  ;;  %v2154_v51 = vld [vmem:[%s2461_s2 + $0x18] sm:$0xff] }
 0x160   : > { %v2159_v52 = vld [vmem:[%s2462_s3 + $0x18] sm:$0xff] }
 0x161   : > { %1614 = vmatmul.msk.bf16.vlgmr.msrb.gmra.mxu2 %vm879_vm0, %v861_v48 }
 0x166   : > { %v793_v54 = vpop.f32.mrf.mxu1 }
 0x16e   : > { %v795_v55 = vpop.f32.mrf.mxu1 }
 0x16f   : > { %v862_v56 = vpack.c.bf16 %v795_v55, %v793_v54  ;;  %v2166_v54 = vld [vmem:[%s2462_s3 + $0x8] sm:$0xff] }
 0x170   : > { %v1133_v63 = vmul.f32 %v2166_v54, %v2041_v6 }
 0x171   : > { %1615 = vmatmul.msk.bf16.vlgmr.msra.gmra.mxu3 %vm879_vm0, %v862_v56 }
 0x181   : > { %1624 = vmatmul.msk.bf16.vlgmr.msrb.gmra.mxu3 %vm879_vm0, %v921_v59  ;;  %v1135_v59 = vmul.f32 %v2159_v52, %v2058_v38 }
 0x182   : > { %v1047_v60 = vpop.permute.xlu2 %1046 }
 0x18a   : > { %v1059_v10 = vpop.permute.xlu2 %1058 }
 0x191   : > { %1625 = vmatmul.msk.bf16.gmra.mxu3 %vm879_vm0, %v922_v2  ;;  %v856_v2 = vpop.f32.mrf.mxu2 }
 0x192   : > { %v1015_v7 = vpop.permute.xlu2 %1014  ;;  %v924_v15 = vpack.c.bf16 %v856_v2, %v854_v5 }
 0x193   : > { %v1071_v8 = vsel %vm1070_vm11, %v1015_v7, %v1047_v60 }
 0x194   : > { %v1080_v9 = vsel %vm1079_vm12, %v1071_v8, %v1015_v7 }
 0x195   : > { %v1089_v12 = vsel %vm1088_vm13, %v1080_v9, %v1047_v60 }
 0x196   : > { %v1097_v62 = vsel %vm879_vm0, %v1089_v12, %v1015_v7 }
 0x197   : > { %v1106_v11 = vsel %vm1105_vm14, %v1097_v62, %v1047_v60 }
 0x198   : > { %v1115_v16 = vsel %vm1114_vm15, %v1106_v11, %v1015_v7 }
 0x199   : > { %v1124_v19 = vsel %vm1123_vm1, %v1115_v16, %v1047_v60 }
 0x19a   : > { %v1140_v21 = vmul.f32 %v1124_v19, %v2103_v14  ;;  %v1053_v22 = vpop.permute.xlu2 %1052 }
 0x19b   : > { %v1027_v23 = vpop.permute.xlu1 %1026 }
 0x19c   : > { %v1148_v24 = vadd.f32 %v1140_v21, %v1132_v20  ;;  %v1077_v25 = vsel %vm1070_vm11, %v1027_v23, %v1059_v10  ;;  %v2194_v20 = vld [vmem:[%s2462_s3 + $0x38] sm:$0xff] }
 0x19d   : > { %v1086_v26 = vsel %vm1079_vm12, %v1077_v25, %v1027_v23 }
 0x19e   : > { %v1156_v27 = vpack.c.bf16 %v1148_v24, %v1148_v24  ;;  %v1095_v28 = vsel %vm1088_vm13, %v1086_v26, %v1059_v10  ;;  %v1139_v26 = vmul.f32 %v2194_v20, %v2039_v31  ;;  %v2222_v31 = vld [vmem:[%s2461_s2 + $0x10] sm:$0xff] }
 0x19f   : > { %v1103_v30 = vsel %vm879_vm0, %v1095_v28, %v1027_v23 }
 0x1a0   : > { %1165 = vst.msk [vmem:[%s2119_s24] sm:$0xf] %vm1164_vm2, %v1156_v27  ;;  %v1112_v18 = vsel %vm1105_vm14, %v1103_v30, %v1059_v10 }
 0x1a1   : > { %v1121_v1 = vsel %vm1114_vm15, %v1112_v18, %v1027_v23  ;;  %1626 = vmatmul.msk.bf16.gmra.mxu3 %vm879_vm0, %v923_v29 }
 0x1a2   : > { %v1130_v32 = vsel %vm1123_vm1, %v1121_v1, %v1059_v10  ;;  %v1021_v33 = vpop.permute.xlu2 %1020 }
 0x1a3   : > { %v1146_v35 = vmul.f32 %v1130_v32, %v2134_v17  ;;  %v1074_v36 = vsel %vm1070_vm11, %v1021_v33, %v1053_v22  ;;  %v1049_v37 = vpop.permute.xlu1 %1048 }
 0x1a4   : > { %v1083_v39 = vsel %vm1079_vm12, %v1074_v36, %v1021_v33  ;;  %v1017_v40 = vpop.permute.xlu0 %1016 }
 0x1a5   : > { %v1154_v41 = vadd.f32 %v1146_v35, %v1138_v4  ;;  %v1092_v43 = vsel %vm1088_vm13, %v1083_v39, %v1053_v22  ;;  %v1072_v45 = vsel %vm1070_vm11, %v1017_v40, %v1049_v37 }
 0x1a6   : > { %v1100_v44 = vsel %vm879_vm0, %v1092_v43, %v1021_v33  ;;  %v1081_v47 = vsel %vm1079_vm12, %v1072_v45, %v1017_v40 }
 0x1a7   : > { %v1162_v49 = vpack.c.bf16 %v1154_v41, %v1154_v41  ;;  %v1109_v3 = vsel %vm1105_vm14, %v1100_v44, %v1053_v22  ;;  %v1090_v50 = vsel %vm1088_vm13, %v1081_v47, %v1049_v37 }
 0x1a8   : > { %v1118_v48 = vsel %vm1114_vm15, %v1109_v3, %v1021_v33  ;;  %v1098_v53 = vsel %vm879_vm0, %v1090_v50, %v1017_v40  ;;  %v2217_v33 = vld [vmem:[%s2462_s3 + $0x10] sm:$0xff] }
 0x1a9   : > { %1171 = vst.msk [vmem:[%s2119_s24 + $0x18] sm:$0xf] %vm1164_vm2, %v1162_v49  ;;  %v1127_v55 = vsel %vm1123_vm1, %v1118_v48, %v1053_v22  ;;  %v1107_v56 = vsel %vm1105_vm14, %v1098_v53, %v1049_v37  ;;  %v2201_v22 = vld [vmem:[%s2461_s2 + $0x38] sm:$0xff]  ;;  %v1134_v39 = vmul.f32 %v2217_v33, %v2050_v34  ;;  %v2244_v48 = vld [vmem:[%s2462_s3 + $0x20] sm:$0xff] }
 0x1aa   : > { %v1116_v58 = vsel %vm1114_vm15, %v1107_v56, %v1017_v40  ;;  %v1143_v60 = vmul.f32 %v1127_v55, %v2154_v51  ;;  %v2251_v55 = vld [vmem:[%s2461_s2 + $0x20] sm:$0xff] }
 0x1ab   : > { %v1125_v61 = vsel %vm1123_vm1, %v1116_v58, %v1049_v37  ;;  %v1061_v10 = vpop.permute.xlu1 %1060 }
 0x1ac   : > { %v1029_v7 = vpop.permute.xlu0 %1028  ;;  %v1151_v8 = vadd.f32 %v1143_v60, %v1135_v59  ;;  %v1141_v9 = vmul.f32 %v1125_v61, %v2175_v57  ;;  %v1136_v59 = vmul.f32 %v2244_v48, %v2067_v42  ;;  %v1025_v60 = vpop.permute.xlu2 %1024  ;;  %v2270_v42 = vld [vmem:[%s2461_s2 + $0x28] sm:$0xff] }
 0x1ad   : > { %v1078_v12 = vsel %vm1070_vm11, %v1029_v7, %v1061_v10 }
 0x1ae   : > { %v1087_v62 = vsel %vm1079_vm12, %v1078_v12, %v1029_v7  ;;  %v1159_v38 = vpack.c.bf16 %v1151_v8, %v1151_v8  ;;  %v1149_v11 = vadd.f32 %v1141_v9, %v1133_v63 }
 0x1af   : > { %v1096_v16 = vsel %vm1088_vm13, %v1087_v62, %v1061_v10 }
 0x1b0   : > { %v1104_v19 = vsel %vm879_vm0, %v1096_v16, %v1029_v7  ;;  %1168 = vst.msk [vmem:[%s2119_s24 + $0xc] sm:$0xf] %vm1164_vm2, %v1159_v38  ;;  %v1157_v6 = vpack.c.bf16 %v1149_v11, %v1149_v11 }
 0x1b1   : > { %v1113_v21 = vsel %vm1105_vm14, %v1104_v19, %v1061_v10  ;;  %1627 = vmatmul.msk.bf16.gmra.mxu3 %vm879_vm0, %v924_v15  ;;  %v2279_v15 = vld [vmem:[%s2462_s3 + $0x28] sm:$0xff] }
 0x1b2   : > { %v1122_v23 = vsel %vm1114_vm15, %v1113_v21, %v1029_v7  ;;  %1166 = vst.msk [vmem:[%s2119_s24 + $0x4] sm:$0xf] %vm1164_vm2, %v1157_v6  ;;  %v1137_v21 = vmul.f32 %v2279_v15, %v2074_v46 }
 0x1b3   : > { %v1019_v24 = vpop.permute.xlu1 %1018  ;;  %v1131_v25 = vsel %vm1123_vm1, %v1122_v23, %v1061_v10 }
 0x1b4   : > { %v1051_v27 = vpop.permute.xlu0 %1050  ;;  %v1147_v28 = vmul.f32 %v1131_v25, %v2201_v22 }
 0x1b5   : > { %v1073_v29 = vsel %vm1070_vm11, %v1019_v24, %v1051_v27 }
 0x1b6   : > { %v1082_v30 = vsel %vm1079_vm12, %v1073_v29, %v1019_v24  ;;  %v1155_v18 = vadd.f32 %v1147_v28, %v1139_v26 }
 0x1b7   : > { %v1091_v1 = vsel %vm1088_vm13, %v1082_v30, %v1051_v27 }
 0x1b8   : > { %v1099_v5 = vsel %vm879_vm0, %v1091_v1, %v1019_v24  ;;  %v1163_v32 = vpack.c.bf16 %v1155_v18, %v1155_v18 }
 0x1b9   : > { %v1108_v4 = vsel %vm1105_vm14, %v1099_v5, %v1051_v27 }
 0x1ba   : > { %v1117_v35 = vsel %vm1114_vm15, %v1108_v4, %v1019_v24  ;;  %1172 = vst.msk [vmem:[%s2119_s24 + $0x1c] sm:$0xf] %vm1164_vm2, %v1163_v32 }
 0x1bb   : > { %v1126_v36 = vsel %vm1123_vm1, %v1117_v35, %v1051_v27  ;;  %v1055_v37 = vpop.permute.xlu1 %1054 }
 0x1bc   : > { %v1142_v40 = vmul.f32 %v1126_v36, %v2222_v31  ;;  %v1023_v41 = vpop.permute.xlu0 %1022 }
 0x1bd   : > { %v1075_v43 = vsel %vm1070_vm11, %v1023_v41, %v1055_v37 }
 0x1be   : > { %v1150_v45 = vadd.f32 %v1142_v40, %v1134_v39  ;;  %v1084_v44 = vsel %vm1079_vm12, %v1075_v43, %v1023_v41  ;;  %v2234_v47 = vpop.f32.mrf.mxu0 }
 0x1bf   : > { %v1093_v49 = vsel %vm1088_vm13, %v1084_v44, %v1055_v37  ;;  %v1173_v3 = vsub.f32 0.0, %v2234_v47  ;;  %1221 = vrot.lane.b32.xlu1 %v2234_v47, %s1725_s26 }
 0x1c0   : > { %v1158_v50 = vpack.c.bf16 %v1150_v45, %v1150_v45  ;;  %v1101_v34 = vsel %vm879_vm0, %v1093_v49, %v1023_v41 }
 0x1c1   : > { %v1110_v53 = vsel %vm1105_vm14, %v1101_v34, %v1055_v37  ;;  %1189 = vrot.lane.b32.xlu0 %v1173_v3, %s1726_s27 }
 0x1c2   : > { %1167 = vst.msk [vmem:[%s2119_s24 + $0x8] sm:$0xf] %vm1164_vm2, %v1158_v50  ;;  %v1119_v56 = vsel %vm1114_vm15, %v1110_v53, %v1023_v41 }
 0x1c3   : > { %v1128_v58 = vsel %vm1123_vm1, %v1119_v56, %v1055_v37 }
 0x1c4   : > { %v1057_v61 = vpop.permute.xlu0 %1056  ;;  %v1144_v10 = vmul.f32 %v1128_v58, %v2251_v55 }
 0x1c5   : > { %v1076_v63 = vsel %vm1070_vm11, %v1025_v60, %v1057_v61 }
 0x1c6   : > { %v1085_v2 = vsel %vm1079_vm12, %v1076_v63, %v1025_v60  ;;  %v2262_v7 = vpop.f32.mrf.mxu0  ;;  %v1152_v8 = vadd.f32 %v1144_v10, %v1136_v59 }
 0x1c7   : > { %v1094_v9 = vsel %vm1088_vm13, %v1085_v2, %v1057_v61  ;;  %v1174_v12 = vsub.f32 0.0, %v2262_v7 }
 0x1c8   : > { %v1102_v62 = vsel %vm879_vm0, %v1094_v9, %v1025_v60  ;;  %v1160_v38 = vpack.c.bf16 %v1152_v8, %v1152_v8 }
 0x1c9   : > { %v1111_v11 = vsel %vm1105_vm14, %v1102_v62, %v1057_v61  ;;  %1223 = vrot.lane.b32.xlu0 %v2262_v7, %s1725_s26  ;;  %1191 = vrot.lane.b32.xlu2 %v1174_v12, %s1726_s27  ;;  %v1301_v12 = vmul.f32 %v2098_v13, %v2234_v47 }
 0x1ca   : > { %v1120_v16 = vsel %vm1114_vm15, %v1111_v11, %v1025_v60  ;;  %1169 = vst.msk [vmem:[%s2119_s24 + $0x10] sm:$0xf] %vm1164_vm2, %v1160_v38 }
 0x1cb   : > { %v1129_v19 = vsel %vm1123_vm1, %v1120_v16, %v1057_v61 }
 0x1cc   : > { %v1145_v6 = vmul.f32 %v1129_v19, %v2270_v42 }
 0x1ce   : > { %v2288_v23 = vpop.f32.mrf.mxu0  ;;  %v1153_v24 = vadd.f32 %v1145_v6, %v1137_v21 }
 0x1cf   : > { %v1175_v25 = vsub.f32 0.0, %v2288_v23 }
 0x1d0   : > { %v1161_v26 = vpack.c.bf16 %v1153_v24, %v1153_v24 }
 0x1d1   : > { %1225 = vrot.lane.b32.xlu2 %v2288_v23, %s1725_s26  ;;  %1193 = vrot.lane.b32.xlu1 %v1175_v25, %s1726_s27 }
 0x1d2   : > { %1170 = vst.msk [vmem:[%s2119_s24 + $0x14] sm:$0xf] %vm1164_vm2, %v1161_v26 }
 0x1d6   : > { %v2296_v27 = vpop.f32.mrf.mxu0 }
 0x1d7   : > { %v1176_v28 = vsub.f32 0.0, %v2296_v27 }
 0x1d9   : > { %1227 = vrot.lane.b32.xlu1 %v2296_v27, %s1725_s26  ;;  %1195 = vrot.lane.b32.xlu0 %v1176_v28, %s1726_s27  ;;  %v1302_v28 = vmul.f32 %v2166_v54, %v2262_v7  ;;  %v1303_v7 = vmul.f32 %v2217_v33, %v2288_v23  ;;  %v1304_v23 = vmul.f32 %v2159_v52, %v2296_v27 }
 0x1e4   : > { %v2302_v46 = vpop.f32.mrf.mxu2 }
 0x1e5   : > { %v1177_v29 = vsub.f32 0.0, %v2302_v46  ;;  %1229 = vrot.lane.b32.xlu0 %v2302_v46, %s1725_s26  ;;  %v1305_v27 = vmul.f32 %v2244_v48, %v2302_v46 }
 0x1e7   : > { %1197 = vrot.lane.b32.xlu2 %v1177_v29, %s1726_s27 }
 0x1ec   : > { %v2308_v30 = vpop.f32.mrf.mxu2 }
 0x1ed   : > { %v1178_v18 = vsub.f32 0.0, %v2308_v30  ;;  %v1306_v46 = vmul.f32 %v2279_v15, %v2308_v30 }
 0x1ef   : > { %1199 = vrot.lane.b32.xlu1 %v1178_v18, %s1726_s27 }
 0x1f4   : > { %v2312_v1 = vpop.f32.mrf.mxu3 }
 0x1f5   : > { %v1179_v5 = vsub.f32 0.0, %v2312_v1 }
 0x1f7   : > { %1233 = vrot.lane.b32.xlu1 %v2312_v1, %s1725_s26  ;;  %1201 = vrot.lane.b32.xlu0 %v1179_v5, %s1726_s27 }
 0x1fc   : > { %v2318_v32 = vpop.f32.mrf.mxu3 }
 0x1fd   : > { %v1180_v4 = vsub.f32 0.0, %v2318_v32 }
 0x1ff   : > { %1203 = vrot.lane.b32.xlu2 %v1180_v4, %s1726_s27  ;;  %1235 = vrot.lane.b32.xlu0 %v2318_v32, %s1725_s26 }
 0x204   : > { %v962_v35 = vpop.f32.mrf.mxu3 }
 0x205   : > { %v1341_v36 = vpack.c.bf16 %v962_v35, %v962_v35 }
 0x207   : > { %1349 = vst.msk [vmem:[%s2328_s12] sm:$0xf] %vm1164_vm2, %v1341_v36  ;;  %1231 = vrot.lane.b32.xlu2 %v2308_v30, %s1725_s26  ;;  %v1307_v30 = vmul.f32 %v2127_v0, %v2312_v1  ;;  %v1308_v1 = vmul.f32 %v2194_v20, %v2318_v32 }
 0x20c   : > { %v964_v37 = vpop.f32.mrf.mxu3 }
 0x20d   : > { %v1342_v39 = vpack.c.bf16 %v964_v37, %v964_v37 }
 0x20f   : > { %1350 = vst.msk [vmem:[%s2328_s12 + $0x4] sm:$0xf] %vm1164_vm2, %v1342_v39 }
 0x214   : > { %v967_v40 = vpop.f32.mrf.mxu3 }
 0x215   : > { %v1343_v41 = vpack.c.bf16 %v967_v40, %v967_v40 }
 0x217   : > { %1351 = vst.msk [vmem:[%s2328_s12 + $0x8] sm:$0xf] %vm1164_vm2, %v1343_v41 }
 0x21c   : > { %v969_v43 = vpop.f32.mrf.mxu3 }
 0x21d   : > { %v1344_v45 = vpack.c.bf16 %v969_v43, %v969_v43 }
 0x21f   : > { %1352 = vst.msk [vmem:[%s2328_s12 + $0xc] sm:$0xf] %vm1164_vm2, %v1344_v45 }
 0x223   : > { %v1192_v2 = vpop.permute.xlu2 %1191 }
 0x224   : > { %v972_v44 = vpop.f32.mrf.mxu3 }
 0x225   : > { %v1345_v49 = vpack.c.bf16 %v972_v44, %v972_v44 }
 0x227   : > { %1353 = vst.msk [vmem:[%s2328_s12 + $0x10] sm:$0xf] %vm1164_vm2, %v1345_v49 }
 0x22b   : > { %v1226_v29 = vpop.permute.xlu2 %1225 }
 0x22c   : > { %v974_v3 = vpop.f32.mrf.mxu3 }
 0x22d   : > { %v1346_v50 = vpack.c.bf16 %v974_v3, %v974_v3 }
 0x22f   : > { %1354 = vst.msk [vmem:[%s2328_s12 + $0x14] sm:$0xf] %vm1164_vm2, %v1346_v50 }
 0x231   : > { %v1222_v34 = vpop.permute.xlu1 %1221 }
 0x233   : > { %v1190_v53 = vpop.permute.xlu0 %1189 }
 0x234   : > { %v1245_v56 = vsel %vm1070_vm11, %v1190_v53, %v1222_v34  ;;  %v977_v58 = vpop.f32.mrf.mxu3 }
 0x235   : > { %v1253_v59 = vsel %vm1079_vm12, %v1245_v56, %v1190_v53  ;;  %v1347_v60 = vpack.c.bf16 %v977_v58, %v977_v58 }
 0x236   : > { %v1261_v61 = vsel %vm1088_vm13, %v1253_v59, %v1222_v34 }
 0x237   : > { %v1269_v10 = vsel %vm879_vm0, %v1261_v61, %v1190_v53  ;;  %1355 = vst.msk [vmem:[%s2328_s12 + $0x18] sm:$0xf] %vm1164_vm2, %v1347_v60 }
 0x238   : > { %v1277_v63 = vsel %vm1105_vm14, %v1269_v10, %v1222_v34 }
 0x239   : > { %v1285_v8 = vsel %vm1114_vm15, %v1277_v63, %v1190_v53 }
 0x23a   : > { %v1293_v9 = vsel %vm1123_vm1, %v1285_v8, %v1222_v34 }
 0x23b   : > { %v1309_v62 = vmul.f32 %v1293_v9, %v2103_v14  ;;  %v1224_v38 = vpop.permute.xlu0 %1223 }
 0x23c   : > { %v1246_v11 = vsel %vm1070_vm11, %v1192_v2, %v1224_v38  ;;  %v979_v16 = vpop.f32.mrf.mxu3 }
 0x23d   : > { %v1317_v19 = vadd.f32 %v1309_v62, %v1301_v12  ;;  %v1254_v6 = vsel %vm1079_vm12, %v1246_v11, %v1192_v2  ;;  %v1348_v21 = vpack.c.bf16 %v979_v16, %v979_v16 }
 0x23e   : > { %v1262_v24 = vsel %vm1088_vm13, %v1254_v6, %v1224_v38 }
 0x23f   : > { %v1325_v25 = vpack.c.bf16 %v1317_v19, %v1317_v19  ;;  %v1270_v13 = vsel %vm879_vm0, %v1262_v24, %v1192_v2  ;;  %1356 = vst.msk [vmem:[%s2328_s12 + $0x1c] sm:$0xf] %vm1164_vm2, %v1348_v21 }
 0x240   : > { %v1278_v14 = vsel %vm1105_vm14, %v1270_v13, %v1224_v38 }
 0x241   : > { %1333 = vst.msk [vmem:[%s2362_s13] sm:$0xf] %vm1164_vm2, %v1325_v25  ;;  %v1286_v47 = vsel %vm1114_vm15, %v1278_v14, %v1192_v2  ;;  %v1198_v59 = vpop.permute.xlu2 %1197 }
 0x242   : > { %v1294_v26 = vsel %vm1123_vm1, %v1286_v47, %v1224_v38 }
 0x243   : > { %v1310_v18 = vmul.f32 %v1294_v26, %v2175_v57  ;;  %v1194_v5 = vpop.permute.xlu1 %1193 }
 0x244   : > { %v1247_v4 = vsel %vm1070_vm11, %v1194_v5, %v1226_v29 }
 0x245   : > { %v1318_v35 = vadd.f32 %v1310_v18, %v1302_v28  ;;  %v1255_v36 = vsel %vm1079_vm12, %v1247_v4, %v1194_v5 }
 0x246   : > { %v1263_v37 = vsel %vm1088_vm13, %v1255_v36, %v1226_v29 }
 0x247   : > { %v1326_v39 = vpack.c.bf16 %v1318_v35, %v1318_v35  ;;  %v1271_v40 = vsel %vm879_vm0, %v1263_v37, %v1194_v5 }
 0x248   : > { %v1279_v41 = vsel %vm1105_vm14, %v1271_v40, %v1226_v29 }
 0x249   : > { %1334 = vst.msk [vmem:[%s2362_s13 + $0x4] sm:$0xf] %vm1164_vm2, %v1326_v39  ;;  %v1287_v54 = vsel %vm1114_vm15, %v1279_v41, %v1194_v5 }
 0x24a   : > { %v1295_v57 = vsel %vm1123_vm1, %v1287_v54, %v1226_v29 }
 0x24b   : > { %v1311_v43 = vmul.f32 %v1295_v57, %v2222_v31  ;;  %v1228_v45 = vpop.permute.xlu1 %1227  ;;  %v1196_v44 = vpop.permute.xlu0 %1195 }
 0x24c   : > { %v1248_v49 = vsel %vm1070_vm11, %v1196_v44, %v1228_v45 }
 0x24d   : > { %v1319_v3 = vadd.f32 %v1311_v43, %v1303_v7  ;;  %v1256_v50 = vsel %vm1079_vm12, %v1248_v49, %v1196_v44 }
 0x24e   : > { %v1264_v34 = vsel %vm1088_vm13, %v1256_v50, %v1228_v45 }
 0x24f   : > { %v1327_v53 = vpack.c.bf16 %v1319_v3, %v1319_v3  ;;  %v1272_v56 = vsel %vm879_vm0, %v1264_v34, %v1196_v44 }
 0x250   : > { %v1280_v58 = vsel %vm1105_vm14, %v1272_v56, %v1228_v45 }
 0x251   : > { %1335 = vst.msk [vmem:[%s2362_s13 + $0x8] sm:$0xf] %vm1164_vm2, %v1327_v53  ;;  %v1288_v33 = vsel %vm1114_vm15, %v1280_v58, %v1196_v44 }
 0x252   : > { %v1296_v31 = vsel %vm1123_vm1, %v1288_v33, %v1228_v45 }
 0x253   : > { %v1312_v60 = vmul.f32 %v1296_v31, %v2154_v51 }
 0x255   : > { %v1320_v61 = vadd.f32 %v1312_v60, %v1304_v23 }
 0x257   : > { %v1328_v10 = vpack.c.bf16 %v1320_v61, %v1320_v61  ;;  %v1230_v63 = vpop.permute.xlu0 %1229 }
 0x258   : > { %v1249_v2 = vsel %vm1070_vm11, %v1198_v59, %v1230_v63 }
 0x259   : > { %1336 = vst.msk [vmem:[%s2362_s13 + $0xc] sm:$0xf] %vm1164_vm2, %v1328_v10  ;;  %v1257_v8 = vsel %vm1079_vm12, %v1249_v2, %v1198_v59  ;;  %v1204_v9 = vpop.permute.xlu2 %1203 }
 0x25a   : > { %v1265_v12 = vsel %vm1088_vm13, %v1257_v8, %v1230_v63 }
 0x25b   : > { %v1273_v62 = vsel %vm879_vm0, %v1265_v12, %v1198_v59 }
 0x25c   : > { %v1281_v38 = vsel %vm1105_vm14, %v1273_v62, %v1230_v63 }
 0x25d   : > { %v1289_v52 = vsel %vm1114_vm15, %v1281_v38, %v1198_v59 }
 0x25e   : > { %v1297_v51 = vsel %vm1123_vm1, %v1289_v52, %v1230_v63 }
 0x25f   : > { %v1313_v11 = vmul.f32 %v1297_v51, %v2251_v55 }
 0x261   : > { %v1321_v16 = vadd.f32 %v1313_v11, %v1305_v27  ;;  %v1232_v19 = vpop.permute.xlu2 %1231  ;;  %v1200_v6 = vpop.permute.xlu1 %1199 }
 0x262   : > { %v1250_v21 = vsel %vm1070_vm11, %v1200_v6, %v1232_v19 }
 0x263   : > { %v1329_v24 = vpack.c.bf16 %v1321_v16, %v1321_v16  ;;  %v1258_v25 = vsel %vm1079_vm12, %v1250_v21, %v1200_v6 }
 0x264   : > { %v1266_v13 = vsel %vm1088_vm13, %v1258_v25, %v1232_v19 }
 0x265   : > { %1337 = vst.msk [vmem:[%s2362_s13 + $0x10] sm:$0xf] %vm1164_vm2, %v1329_v24  ;;  %v1274_v14 = vsel %vm879_vm0, %v1266_v13, %v1200_v6 }
 0x266   : > { %v1282_v47 = vsel %vm1105_vm14, %v1274_v14, %v1232_v19 }
 0x267   : > { %v1290_v48 = vsel %vm1114_vm15, %v1282_v47, %v1200_v6 }
 0x268   : > { %v1298_v55 = vsel %vm1123_vm1, %v1290_v48, %v1232_v19 }
 0x269   : > { %v1314_v26 = vmul.f32 %v1298_v55, %v2270_v42  ;;  %v1234_v28 = vpop.permute.xlu1 %1233  ;;  %v1202_v29 = vpop.permute.xlu0 %1201 }
 0x26a   : > { %v1251_v18 = vsel %vm1070_vm11, %v1202_v29, %v1234_v28 }
 0x26b   : > { %v1322_v5 = vadd.f32 %v1314_v26, %v1306_v46  ;;  %v1259_v4 = vsel %vm1079_vm12, %v1251_v18, %v1202_v29 }
 0x26c   : > { %v1267_v35 = vsel %vm1088_vm13, %v1259_v4, %v1234_v28 }
 0x26d   : > { %v1330_v36 = vpack.c.bf16 %v1322_v5, %v1322_v5  ;;  %v1275_v37 = vsel %vm879_vm0, %v1267_v35, %v1202_v29 }
 0x26e   : > { %v1283_v39 = vsel %vm1105_vm14, %v1275_v37, %v1234_v28 }
 0x26f   : > { %1338 = vst.msk [vmem:[%s2362_s13 + $0x14] sm:$0xf] %vm1164_vm2, %v1330_v36  ;;  %v1291_v15 = vsel %vm1114_vm15, %v1283_v39, %v1202_v29 }
 0x270   : > { %v1299_v42 = vsel %vm1123_vm1, %v1291_v15, %v1234_v28 }
 0x271   : > { %v1315_v40 = vmul.f32 %v1299_v42, %v2134_v17  ;;  %v1236_v41 = vpop.permute.xlu0 %1235 }
 0x272   : > { %v1252_v54 = vsel %vm1070_vm11, %v1204_v9, %v1236_v41 }
 0x273   : > { %v1323_v57 = vadd.f32 %v1315_v40, %v1307_v30  ;;  %v1260_v7 = vsel %vm1079_vm12, %v1252_v54, %v1204_v9 }
 0x274   : > { %v1268_v43 = vsel %vm1088_vm13, %v1260_v7, %v1236_v41 }
 0x275   : > { %v1331_v45 = vpack.c.bf16 %v1323_v57, %v1323_v57  ;;  %v1276_v44 = vsel %vm879_vm0, %v1268_v43, %v1204_v9 }
 0x276   : > { %v1284_v49 = vsel %vm1105_vm14, %v1276_v44, %v1236_v41 }
 0x277   : > { %1339 = vst.msk [vmem:[%s2362_s13 + $0x18] sm:$0xf] %vm1164_vm2, %v1331_v45  ;;  %v1292_v0 = vsel %vm1114_vm15, %v1284_v49, %v1204_v9 }
 0x278   : > { %v1300_v17 = vsel %vm1123_vm1, %v1292_v0, %v1236_v41 }
 0x279   : > { %v1316_v3 = vmul.f32 %v1300_v17, %v2201_v22 }
 0x27b   : > { %v1324_v50 = vadd.f32 %v1316_v3, %v1308_v1 }
 0x27d   : > { %v1332_v34 = vpack.c.bf16 %v1324_v50, %v1324_v50 }
 0x27f   : > { %1340 = vst.msk [vmem:[%s2362_s13 + $0x1c] sm:$0xf] %vm1164_vm2, %v1332_v34 }
 0x280 PF: > { %s22_s19 = sadd.s32 1, %s1722_s19   ;;  %s2481_s17 = smov %s1718_s18 }
 0x281   : > { %p19_p5 = scmp.ge.s32.totalorder %s22_s19, 4   ;;  %s2482_s18 = smov %s2484_s20 }
 0x283   :  { %21 = sbr.rel (!%p19_p5) target bundleno = 2 (0x2), region = 116 }

</bundles_post_ra>
